<compile_context>
chip_gen: v7x
topology: tpu7x:2x2x1
jax: 0.10.0
libtpu: 0.0.40
codegen_flags: <defaults>
</compile_context>

<pallas_src>
import numpy as np
import jax
import jax.numpy as jnp
from jax import lax
from jax.experimental import pallas as pl
from jax.experimental.pallas import tpu as pltpu

EPS = 1e-5   # torch BatchNorm2d default

# 3x3 / pad-1 tap offsets, row-major over (kh, kw).  The 2x2 / pad-0 residual
# conv uses the subset with (dh, dw) in {0,1}^2: indices 4, 5, 7, 8.
TAPS3 = [(kh - 1, kw - 1) for kh in range(3) for kw in range(3)]


# ---------------------------------------------------------------------------
# Host-side (trace-time) geometry constants
# ---------------------------------------------------------------------------
def _build_masks(N, H, W):
    """(9, N*H*W) f32: validity of each 3x3 tap on the flattened (n,h,w) lane axis."""
    lane = np.arange(N * H * W)
    w_idx = lane % W
    h_idx = (lane // W) % H
    m = np.zeros((9, N * H * W), np.float32)
    for k, (dh, dw) in enumerate(TAPS3):
        hh, ww = h_idx + dh, w_idx + dw
        m[k] = ((hh >= 0) & (hh < H) & (ww >= 0) & (ww < W)).astype(np.float32)
    return m


def _build_dmat(N, H, W, Ho, Wo):
    """(R, R3) 0/1 selection: output column q=(n,ho,wo) picks input column (n,2ho,2wo)."""
    R, R3 = N * H * W, N * Ho * Wo
    d = np.zeros((R, R3), np.float32)
    q = np.arange(R3)
    r = (q // (Ho * Wo)) * (H * W) + 2 * ((q // Wo) % Ho) * W + 2 * (q % Wo)
    d[r, q] = 1.0
    return d


# ---------------------------------------------------------------------------
# Kernel
# ---------------------------------------------------------------------------
def _make_kernel(Cin, W, R):
    def kernel(x_ref, m_ref, d_ref, w1_ref, w2_ref, w3_ref, wr_ref,
               gb12_ref, gb3r_ref, out_ref, out2_ref):
        dmat = d_ref[...]            # (R, R3) bf16 (exact 0/1)
        gb12 = gb12_ref[...]         # (Cin, 4)  = [g1 b1 g2 b2]
        gb3r = gb3r_ref[...]         # (Cout, 4) = [g3 b3 gr br]

        def slab(src, tap_ids):
            """Stack masked, lane-rolled taps along sublanes -> (T*Cin, R) bf16."""
            rows = []
            for k in tap_ids:
                dh, dw = TAPS3[k]
                if dh == 0 and dw == 0:
                    rows.append(src)                       # center tap: no shift/mask
                else:
                    off = dh * W + dw
                    shifted = pltpu.roll(src, (-off) % R, axis=1)   # XLU lane rotate
                    rows.append(shifted * m_ref[k:k + 1, :])        # zero OOB taps
            return jnp.concatenate(rows, axis=0).astype(jnp.bfloat16)

        def bn(v, gamma, beta):
            """Training-mode BatchNorm, two-pass stats, folded to scale/shift (f32)."""
            inv = 1.0 / v.shape[1]
            mean = jnp.sum(v, axis=1, keepdims=True) * inv
            c = v - mean
            var = jnp.sum(c * c, axis=1, keepdims=True) * inv
            return c * (gamma * lax.rsqrt(var + EPS)) + beta        # EUP rsqrt

        relu = lambda v: jnp.maximum(v, 0.0)
        dot = lambda a, b: jnp.dot(a, b, preferred_element_type=jnp.float32)

        x_slab = slab(x_ref[...], range(9))                         # (9*Cin, R) bf16

        # conv1: 3x3 s1 p1 + BN + ReLU            (stays in VMEM)
        out1 = relu(bn(dot(w1_ref[...], x_slab), gb12[:, 0:1], gb12[:, 1:2]))

        # conv2: 3x3 s1 p1 + BN + ReLU            (this is out2_skip)
        out2 = relu(bn(dot(w2_ref[...], slab(out1, range(9))),
                       gb12[:, 2:3], gb12[:, 3:4]))
        out2_ref[...] = out2

        # conv3: 3x3 s2 p1 -> full-res stride-1 conv, then select cols (n,2h,2w)
        c3 = dot(dot(w3_ref[...], slab(out2, range(9))).astype(jnp.bfloat16), dmat)
        out3 = relu(bn(c3, gb3r[:, 0:1], gb3r[:, 1:2]))

        # residual: 2x2 s2 p0 + BN (no ReLU); reuses the x tap slab and dmat.
        # Taps (0,0),(0,1),(1,0),(1,1) are slab row blocks 4,5 and 7,8.
        res_slab = jnp.concatenate(
            [x_slab[4 * Cin:6 * Cin], x_slab[7 * Cin:9 * Cin]], axis=0)
        res = dot(dot(wr_ref[...], res_slab).astype(jnp.bfloat16), dmat)
        res = bn(res, gb3r[:, 2:3], gb3r[:, 3:4])

        out_ref[...] = relu(out3 + res)

    return kernel


# ---------------------------------------------------------------------------
# EncoderResidualBlock forward (public interface keeps PyTorch's NCHW layout)
# ---------------------------------------------------------------------------
def encoder_residual_block(x_nchw, p):
    N, Cin, H, W = x_nchw.shape
    Cout = p["w3"].shape[0]
    Ho = (H + 2 - 3) // 2 + 1
    Wo = (W + 2 - 3) // 2 + 1
    R, R3 = N * H * W, N * Ho * Wo

    # channel-major, lane-dense layout: (C, N*H*W)
    x_flat = jnp.transpose(x_nchw, (1, 0, 2, 3)).reshape(Cin, R)

    def stack_w(w):
        # torch (Cout, Cin, KH, KW) -> (Cout, KH*KW*Cin) bf16, column order
        # (kh, kw, cin) matching the kernel's slab row order.
        return jnp.transpose(w, (0, 2, 3, 1)).reshape(w.shape[0], -1).astype(jnp.bfloat16)

    w1s, w2s = stack_w(p["w1"]), stack_w(p["w2"])
    w3s, wrs = stack_w(p["w3"]), stack_w(p["wr"])

    # Conv biases intentionally omitted: training-mode BN's batch-mean
    # subtraction cancels any per-channel bias exactly.
    gb12 = jnp.stack([p["g1"], p["be1"], p["g2"], p["be2"]], axis=1)   # (Cin, 4)
    gb3r = jnp.stack([p["g3"], p["be3"], p["gr"], p["ber"]], axis=1)   # (Cout, 4)

    # Geometry constants baked at trace time (no in-kernel iota/div/mod work).
    masks = jnp.asarray(_build_masks(N, H, W))                          # (9, R) f32
    dmat = jnp.asarray(_build_dmat(N, H, W, Ho, Wo), dtype=jnp.bfloat16)

    kernel = _make_kernel(Cin, W, R)

    def fs(shape):
        nd = len(shape)
        return pl.BlockSpec(shape, lambda i, nd=nd: (0,) * nd)

    args = (x_flat, masks, dmat, w1s, w2s, w3s, wrs, gb12, gb3r)
    out_flat, out2_flat = pl.pallas_call(
        kernel,
        out_shape=(jax.ShapeDtypeStruct((Cout, R3), jnp.float32),
                   jax.ShapeDtypeStruct((Cin, R), jnp.float32)),
        grid=(1,),
        in_specs=[fs(a.shape) for a in args],
        out_specs=(fs((Cout, R3)), fs((Cin, R))),
        compiler_params=pltpu.CompilerParams(
            dimension_semantics=("arbitrary",),
            vmem_limit_bytes=32 * 1024 * 1024),
    )(*args)

    out = jnp.transpose(out_flat.reshape(Cout, N, Ho, Wo), (1, 0, 2, 3))
    out2 = jnp.transpose(out2_flat.reshape(Cin, N, H, W), (1, 0, 2, 3))
    return out, out2


# ---------------------------------------------------------------------------
# Pure-JAX reference (lax.conv, with biases, f32) for a numerical sanity check
# ---------------------------------------------------------------------------
def ref_forward(x, p):
    def conv(v, w, b, stride, pad):
        out = lax.conv_general_dilated(v, w, (stride, stride), [(pad, pad)] * 2,
                                       dimension_numbers=("NCHW", "OIHW", "NCHW"),
                                       precision=lax.Precision.HIGHEST)
        return out + b[None, :, None, None]

    def bn(v, g, be):
        mean = v.mean(axis=(0, 2, 3), keepdims=True)
        var = ((v - mean) ** 2).mean(axis=(0, 2, 3), keepdims=True)
        return (v - mean) * lax.rsqrt(var + EPS) * g[None, :, None, None] \
            + be[None, :, None, None]

    relu = lambda v: jnp.maximum(v, 0.0)
    res = bn(conv(x, p["wr"], p["br"], 2, 0), p["gr"], p["ber"])
    out1 = relu(bn(conv(x, p["w1"], p["b1"], 1, 1), p["g1"], p["be1"]))
    out2 = relu(bn(conv(out1, p["w2"], p["b2"], 1, 1), p["g2"], p["be2"]))
    out3 = relu(bn(conv(out2, p["w3"], p["b3"], 2, 1), p["g3"], p["be3"]))
    return relu(out3 + res), out2


# ---------------------------------------------------------------------------
def init_params(key, in_ch, out_ch):
    ks = iter(jax.random.split(key, 20))
    nrm = lambda shape, s=0.1: jax.random.normal(next(ks), shape, jnp.float32) * s

    def block(ci, co, k):
        return (nrm((co, ci, k, k)), nrm((co,)),          # conv w, b
                1.0 + nrm((co,)), nrm((co,)))             # bn gamma, beta

    w1, b1, g1, be1 = block(in_ch, in_ch, 3)
    w2, b2, g2, be2 = block(in_ch, in_ch, 3)
    w3, b3, g3, be3 = block(in_ch, out_ch, 3)
    wr, br, gr, ber = block(in_ch, out_ch, 2)
    return dict(w1=w1, b1=b1, g1=g1, be1=be1, w2=w2, b2=b2, g2=g2, be2=be2,
                w3=w3, b3=b3, g3=g3, be3=be3, wr=wr, br=br, gr=gr, ber=ber)


if __name__ == "__main__":
    key = jax.random.PRNGKey(0)
    k_x, k_p = jax.random.split(key)
    N, Cin, Cout, H, W = 2, 4, 8, 16, 16
    x = jax.random.normal(k_x, (N, Cin, H, W), jnp.float32)     # NCHW, like PyTorch
    params = init_params(k_p, Cin, Cout)

    fwd = jax.jit(encoder_residual_block)
    out_relu, out2_skip = fwd(x, params)
    jax.block_until_ready((out_relu, out2_skip))

    assert out_relu.shape == (N, Cout, H // 2, W // 2)
    assert out2_skip.shape == (N, Cin, H, W)

    ref_out, ref_skip = ref_forward(x, params)
    # bf16 MXU operands (hardware-native path) bound the elementwise error to
    # ~1e-2 worst-case across three conv/BN layers; 3e-2 keeps margin while
    # still catching any real indexing/layout bug.
    assert jnp.allclose(out2_skip, ref_skip, atol=3e-2, rtol=3e-2), "out2_skip mismatch"
    assert jnp.allclose(out_relu, ref_out, atol=3e-2, rtol=3e-2), "out_relu mismatch"

    print("KERNEL_OK")
</pallas_src>

<mosaic_0001>
module attributes {stable_mosaic.version = 11 : i64} {
  func.func @kernel(%arg0: i32, %arg1: memref<4x512xf32, #tpu.memory_space<vmem>>, %arg2: memref<9x512xf32, #tpu.memory_space<vmem>>, %arg3: memref<512x128xbf16, #tpu.memory_space<vmem>>, %arg4: memref<4x36xbf16, #tpu.memory_space<vmem>>, %arg5: memref<4x36xbf16, #tpu.memory_space<vmem>>, %arg6: memref<8x36xbf16, #tpu.memory_space<vmem>>, %arg7: memref<8x16xbf16, #tpu.memory_space<vmem>>, %arg8: memref<4x4xf32, #tpu.memory_space<vmem>>, %arg9: memref<8x4xf32, #tpu.memory_space<vmem>>, %arg10: memref<8x128xf32, #tpu.memory_space<vmem>>, %arg11: memref<4x512xf32, #tpu.memory_space<vmem>>) attributes {dimension_semantics = [#tpu.dimension_semantics<arbitrary>], iteration_bounds = array<i64: 1>, scalar_prefetch = 0 : i64, scratch_operands = 0 : i64, tpu.core_type = #tpu.core_type<tc>, window_params = [{pipeline_mode = #tpu.pipeline_mode<synchronous>, transform_indices = @transform_0, window_bounds = array<i64: 4, 512>}, {pipeline_mode = #tpu.pipeline_mode<synchronous>, transform_indices = @transform_1, window_bounds = array<i64: 9, 512>}, {pipeline_mode = #tpu.pipeline_mode<synchronous>, transform_indices = @transform_2, window_bounds = array<i64: 512, 128>}, {pipeline_mode = #tpu.pipeline_mode<synchronous>, transform_indices = @transform_3, window_bounds = array<i64: 4, 36>}, {pipeline_mode = #tpu.pipeline_mode<synchronous>, transform_indices = @transform_4, window_bounds = array<i64: 4, 36>}, {pipeline_mode = #tpu.pipeline_mode<synchronous>, transform_indices = @transform_5, window_bounds = array<i64: 8, 36>}, {pipeline_mode = #tpu.pipeline_mode<synchronous>, transform_indices = @transform_6, window_bounds = array<i64: 8, 16>}, {pipeline_mode = #tpu.pipeline_mode<synchronous>, transform_indices = @transform_7, window_bounds = array<i64: 4, 4>}, {pipeline_mode = #tpu.pipeline_mode<synchronous>, transform_indices = @transform_8, window_bounds = array<i64: 8, 4>}, {pipeline_mode = #tpu.pipeline_mode<synchronous>, transform_indices = @transform_9, window_bounds = array<i64: 8, 128>}, {pipeline_mode = #tpu.pipeline_mode<synchronous>, transform_indices = @transform_10, window_bounds = array<i64: 4, 512>}]} {
    %c0 = arith.constant 0 : index
    %c0_0 = arith.constant 0 : index
    %0 = vector.load %arg3[%c0, %c0_0] : memref<512x128xbf16, #tpu.memory_space<vmem>>, vector<512x128xbf16>
    %c0_1 = arith.constant 0 : index
    %c0_2 = arith.constant 0 : index
    %1 = vector.load %arg8[%c0_1, %c0_2] : memref<4x4xf32, #tpu.memory_space<vmem>>, vector<4x4xf32>
    %c0_3 = arith.constant 0 : index
    %c0_4 = arith.constant 0 : index
    %2 = vector.load %arg9[%c0_3, %c0_4] : memref<8x4xf32, #tpu.memory_space<vmem>>, vector<8x4xf32>
    %c0_5 = arith.constant 0 : index
    %c0_6 = arith.constant 0 : index
    %3 = vector.load %arg1[%c0_5, %c0_6] : memref<4x512xf32, #tpu.memory_space<vmem>>, vector<4x512xf32>
    %c17_i32 = arith.constant 17 : i32
    %4 = tpu.dynamic_rotate %3 by %c17_i32 dim 1 : vector<4x512xf32>, i32 -> vector<4x512xf32>
    %c0_7 = arith.constant 0 : index
    %c0_8 = arith.constant 0 : index
    %5 = vector.load %arg2[%c0_7, %c0_8] : memref<9x512xf32, #tpu.memory_space<vmem>>, vector<1x512xf32>
    %6 = vector.broadcast %5 : vector<1x512xf32> to vector<4x512xf32>
    %7 = arith.mulf %4, %6 : vector<4x512xf32>
    %c16_i32 = arith.constant 16 : i32
    %8 = tpu.dynamic_rotate %3 by %c16_i32 dim 1 : vector<4x512xf32>, i32 -> vector<4x512xf32>
    %c1 = arith.constant 1 : index
    %c0_9 = arith.constant 0 : index
    %9 = vector.load %arg2[%c1, %c0_9] : memref<9x512xf32, #tpu.memory_space<vmem>>, vector<1x512xf32>
    %10 = vector.broadcast %9 : vector<1x512xf32> to vector<4x512xf32>
    %11 = arith.mulf %8, %10 : vector<4x512xf32>
    %c15_i32 = arith.constant 15 : i32
    %12 = tpu.dynamic_rotate %3 by %c15_i32 dim 1 : vector<4x512xf32>, i32 -> vector<4x512xf32>
    %c2 = arith.constant 2 : index
    %c0_10 = arith.constant 0 : index
    %13 = vector.load %arg2[%c2, %c0_10] : memref<9x512xf32, #tpu.memory_space<vmem>>, vector<1x512xf32>
    %14 = vector.broadcast %13 : vector<1x512xf32> to vector<4x512xf32>
    %15 = arith.mulf %12, %14 : vector<4x512xf32>
    %c1_i32 = arith.constant 1 : i32
    %16 = tpu.dynamic_rotate %3 by %c1_i32 dim 1 : vector<4x512xf32>, i32 -> vector<4x512xf32>
    %c3 = arith.constant 3 : index
    %c0_11 = arith.constant 0 : index
    %17 = vector.load %arg2[%c3, %c0_11] : memref<9x512xf32, #tpu.memory_space<vmem>>, vector<1x512xf32>
    %18 = vector.broadcast %17 : vector<1x512xf32> to vector<4x512xf32>
    %19 = arith.mulf %16, %18 : vector<4x512xf32>
    %c511_i32 = arith.constant 511 : i32
    %20 = tpu.dynamic_rotate %3 by %c511_i32 dim 1 : vector<4x512xf32>, i32 -> vector<4x512xf32>
    %c5 = arith.constant 5 : index
    %c0_12 = arith.constant 0 : index
    %21 = vector.load %arg2[%c5, %c0_12] : memref<9x512xf32, #tpu.memory_space<vmem>>, vector<1x512xf32>
    %22 = vector.broadcast %21 : vector<1x512xf32> to vector<4x512xf32>
    %23 = arith.mulf %20, %22 : vector<4x512xf32>
    %c497_i32 = arith.constant 497 : i32
    %24 = tpu.dynamic_rotate %3 by %c497_i32 dim 1 : vector<4x512xf32>, i32 -> vector<4x512xf32>
    %c6 = arith.constant 6 : index
    %c0_13 = arith.constant 0 : index
    %25 = vector.load %arg2[%c6, %c0_13] : memref<9x512xf32, #tpu.memory_space<vmem>>, vector<1x512xf32>
    %26 = vector.broadcast %25 : vector<1x512xf32> to vector<4x512xf32>
    %27 = arith.mulf %24, %26 : vector<4x512xf32>
    %c496_i32 = arith.constant 496 : i32
    %28 = tpu.dynamic_rotate %3 by %c496_i32 dim 1 : vector<4x512xf32>, i32 -> vector<4x512xf32>
    %c7 = arith.constant 7 : index
    %c0_14 = arith.constant 0 : index
    %29 = vector.load %arg2[%c7, %c0_14] : memref<9x512xf32, #tpu.memory_space<vmem>>, vector<1x512xf32>
    %30 = vector.broadcast %29 : vector<1x512xf32> to vector<4x512xf32>
    %31 = arith.mulf %28, %30 : vector<4x512xf32>
    %c495_i32 = arith.constant 495 : i32
    %32 = tpu.dynamic_rotate %3 by %c495_i32 dim 1 : vector<4x512xf32>, i32 -> vector<4x512xf32>
    %c8 = arith.constant 8 : index
    %c0_15 = arith.constant 0 : index
    %33 = vector.load %arg2[%c8, %c0_15] : memref<9x512xf32, #tpu.memory_space<vmem>>, vector<1x512xf32>
    %34 = vector.broadcast %33 : vector<1x512xf32> to vector<4x512xf32>
    %35 = arith.mulf %32, %34 : vector<4x512xf32>
    %36 = tpu.concatenate %7, %11, %15, %19, %3, %23, %27, %31, %35 in 0 : vector<4x512xf32>, vector<4x512xf32>, vector<4x512xf32>, vector<4x512xf32>, vector<4x512xf32>, vector<4x512xf32>, vector<4x512xf32>, vector<4x512xf32>, vector<4x512xf32> -> vector<36x512xf32>
    %37 = arith.truncf %36 : vector<36x512xf32> to vector<36x512xbf16>
    %c0_16 = arith.constant 0 : index
    %c0_17 = arith.constant 0 : index
    %38 = vector.load %arg4[%c0_16, %c0_17] : memref<4x36xbf16, #tpu.memory_space<vmem>>, vector<4x36xbf16>
    %cst = arith.constant dense<0.000000e+00> : vector<4x512xf32>
    %39 = tpu.matmul %38, %37, %cst {dimension_numbers = #tpu.dot_dimension_numbers<[1], [0], [0], [1], [0, 0, 1, 1], [], []>} : vector<4x36xbf16>, vector<36x512xbf16>, vector<4x512xf32> -> vector<4x512xf32>
    %40 = vector.extract_strided_slice %1 {offsets = [0, 0], sizes = [4, 1], strides = [1, 1]} : vector<4x4xf32> to vector<4x1xf32>
    %41 = vector.extract_strided_slice %1 {offsets = [0, 1], sizes = [4, 1], strides = [1, 1]} : vector<4x4xf32> to vector<4x1xf32>
    %cst_18 = arith.constant dense<0.000000e+00> : vector<4xf32>
    %42 = vector.multi_reduction <add>, %39, %cst_18 [1] : vector<4x512xf32> to vector<4xf32>
    %43 = vector.shape_cast %42 : vector<4xf32> to vector<4x1xf32>
    %cst_19 = arith.constant 0.001953125 : f32
    %44 = vector.broadcast %cst_19 : f32 to vector<4x1xf32>
    %45 = arith.mulf %43, %44 : vector<4x1xf32>
    %46 = vector.broadcast %45 : vector<4x1xf32> to vector<4x512xf32>
    %47 = arith.subf %39, %46 : vector<4x512xf32>
    %48 = arith.mulf %47, %47 : vector<4x512xf32>
    %cst_20 = arith.constant dense<0.000000e+00> : vector<4xf32>
    %49 = vector.multi_reduction <add>, %48, %cst_20 [1] : vector<4x512xf32> to vector<4xf32>
    %50 = vector.shape_cast %49 : vector<4xf32> to vector<4x1xf32>
    %cst_21 = arith.constant 0.001953125 : f32
    %51 = vector.broadcast %cst_21 : f32 to vector<4x1xf32>
    %52 = arith.mulf %50, %51 : vector<4x1xf32>
    %cst_22 = arith.constant 9.99999974E-6 : f32
    %53 = vector.broadcast %cst_22 : f32 to vector<4x1xf32>
    %54 = arith.addf %52, %53 : vector<4x1xf32>
    %55 = math.rsqrt %54 : vector<4x1xf32>
    %56 = arith.mulf %40, %55 : vector<4x1xf32>
    %57 = vector.broadcast %56 : vector<4x1xf32> to vector<4x512xf32>
    %58 = arith.mulf %47, %57 : vector<4x512xf32>
    %59 = vector.broadcast %41 : vector<4x1xf32> to vector<4x512xf32>
    %60 = arith.addf %58, %59 : vector<4x512xf32>
    %cst_23 = arith.constant 0.000000e+00 : f32
    %61 = vector.broadcast %cst_23 : f32 to vector<4x512xf32>
    %62 = arith.maximumf %60, %61 : vector<4x512xf32>
    %c0_24 = arith.constant 0 : index
    %c0_25 = arith.constant 0 : index
    %63 = vector.load %arg5[%c0_24, %c0_25] : memref<4x36xbf16, #tpu.memory_space<vmem>>, vector<4x36xbf16>
    %c17_i32_26 = arith.constant 17 : i32
    %64 = tpu.dynamic_rotate %62 by %c17_i32_26 dim 1 : vector<4x512xf32>, i32 -> vector<4x512xf32>
    %c0_27 = arith.constant 0 : index
    %c0_28 = arith.constant 0 : index
    %65 = vector.load %arg2[%c0_27, %c0_28] : memref<9x512xf32, #tpu.memory_space<vmem>>, vector<1x512xf32>
    %66 = vector.broadcast %65 : vector<1x512xf32> to vector<4x512xf32>
    %67 = arith.mulf %64, %66 : vector<4x512xf32>
    %c16_i32_29 = arith.constant 16 : i32
    %68 = tpu.dynamic_rotate %62 by %c16_i32_29 dim 1 : vector<4x512xf32>, i32 -> vector<4x512xf32>
    %c1_30 = arith.constant 1 : index
    %c0_31 = arith.constant 0 : index
    %69 = vector.load %arg2[%c1_30, %c0_31] : memref<9x512xf32, #tpu.memory_space<vmem>>, vector<1x512xf32>
    %70 = vector.broadcast %69 : vector<1x512xf32> to vector<4x512xf32>
    %71 = arith.mulf %68, %70 : vector<4x512xf32>
    %c15_i32_32 = arith.constant 15 : i32
    %72 = tpu.dynamic_rotate %62 by %c15_i32_32 dim 1 : vector<4x512xf32>, i32 -> vector<4x512xf32>
    %c2_33 = arith.constant 2 : index
    %c0_34 = arith.constant 0 : index
    %73 = vector.load %arg2[%c2_33, %c0_34] : memref<9x512xf32, #tpu.memory_space<vmem>>, vector<1x512xf32>
    %74 = vector.broadcast %73 : vector<1x512xf32> to vector<4x512xf32>
    %75 = arith.mulf %72, %74 : vector<4x512xf32>
    %c1_i32_35 = arith.constant 1 : i32
    %76 = tpu.dynamic_rotate %62 by %c1_i32_35 dim 1 : vector<4x512xf32>, i32 -> vector<4x512xf32>
    %c3_36 = arith.constant 3 : index
    %c0_37 = arith.constant 0 : index
    %77 = vector.load %arg2[%c3_36, %c0_37] : memref<9x512xf32, #tpu.memory_space<vmem>>, vector<1x512xf32>
    %78 = vector.broadcast %77 : vector<1x512xf32> to vector<4x512xf32>
    %79 = arith.mulf %76, %78 : vector<4x512xf32>
    %c511_i32_38 = arith.constant 511 : i32
    %80 = tpu.dynamic_rotate %62 by %c511_i32_38 dim 1 : vector<4x512xf32>, i32 -> vector<4x512xf32>
    %c5_39 = arith.constant 5 : index
    %c0_40 = arith.constant 0 : index
    %81 = vector.load %arg2[%c5_39, %c0_40] : memref<9x512xf32, #tpu.memory_space<vmem>>, vector<1x512xf32>
    %82 = vector.broadcast %81 : vector<1x512xf32> to vector<4x512xf32>
    %83 = arith.mulf %80, %82 : vector<4x512xf32>
    %c497_i32_41 = arith.constant 497 : i32
    %84 = tpu.dynamic_rotate %62 by %c497_i32_41 dim 1 : vector<4x512xf32>, i32 -> vector<4x512xf32>
    %c6_42 = arith.constant 6 : index
    %c0_43 = arith.constant 0 : index
    %85 = vector.load %arg2[%c6_42, %c0_43] : memref<9x512xf32, #tpu.memory_space<vmem>>, vector<1x512xf32>
    %86 = vector.broadcast %85 : vector<1x512xf32> to vector<4x512xf32>
    %87 = arith.mulf %84, %86 : vector<4x512xf32>
    %c496_i32_44 = arith.constant 496 : i32
    %88 = tpu.dynamic_rotate %62 by %c496_i32_44 dim 1 : vector<4x512xf32>, i32 -> vector<4x512xf32>
    %c7_45 = arith.constant 7 : index
    %c0_46 = arith.constant 0 : index
    %89 = vector.load %arg2[%c7_45, %c0_46] : memref<9x512xf32, #tpu.memory_space<vmem>>, vector<1x512xf32>
    %90 = vector.broadcast %89 : vector<1x512xf32> to vector<4x512xf32>
    %91 = arith.mulf %88, %90 : vector<4x512xf32>
    %c495_i32_47 = arith.constant 495 : i32
    %92 = tpu.dynamic_rotate %62 by %c495_i32_47 dim 1 : vector<4x512xf32>, i32 -> vector<4x512xf32>
    %c8_48 = arith.constant 8 : index
    %c0_49 = arith.constant 0 : index
    %93 = vector.load %arg2[%c8_48, %c0_49] : memref<9x512xf32, #tpu.memory_space<vmem>>, vector<1x512xf32>
    %94 = vector.broadcast %93 : vector<1x512xf32> to vector<4x512xf32>
    %95 = arith.mulf %92, %94 : vector<4x512xf32>
    %96 = tpu.concatenate %67, %71, %75, %79, %62, %83, %87, %91, %95 in 0 : vector<4x512xf32>, vector<4x512xf32>, vector<4x512xf32>, vector<4x512xf32>, vector<4x512xf32>, vector<4x512xf32>, vector<4x512xf32>, vector<4x512xf32>, vector<4x512xf32> -> vector<36x512xf32>
    %97 = arith.truncf %96 : vector<36x512xf32> to vector<36x512xbf16>
    %cst_50 = arith.constant dense<0.000000e+00> : vector<4x512xf32>
    %98 = tpu.matmul %63, %97, %cst_50 {dimension_numbers = #tpu.dot_dimension_numbers<[1], [0], [0], [1], [0, 0, 1, 1], [], []>} : vector<4x36xbf16>, vector<36x512xbf16>, vector<4x512xf32> -> vector<4x512xf32>
    %99 = vector.extract_strided_slice %1 {offsets = [0, 2], sizes = [4, 1], strides = [1, 1]} : vector<4x4xf32> to vector<4x1xf32>
    %100 = vector.extract_strided_slice %1 {offsets = [0, 3], sizes = [4, 1], strides = [1, 1]} : vector<4x4xf32> to vector<4x1xf32>
    %cst_51 = arith.constant dense<0.000000e+00> : vector<4xf32>
    %101 = vector.multi_reduction <add>, %98, %cst_51 [1] : vector<4x512xf32> to vector<4xf32>
    %102 = vector.shape_cast %101 : vector<4xf32> to vector<4x1xf32>
    %cst_52 = arith.constant 0.001953125 : f32
    %103 = vector.broadcast %cst_52 : f32 to vector<4x1xf32>
    %104 = arith.mulf %102, %103 : vector<4x1xf32>
    %105 = vector.broadcast %104 : vector<4x1xf32> to vector<4x512xf32>
    %106 = arith.subf %98, %105 : vector<4x512xf32>
    %107 = arith.mulf %106, %106 : vector<4x512xf32>
    %cst_53 = arith.constant dense<0.000000e+00> : vector<4xf32>
    %108 = vector.multi_reduction <add>, %107, %cst_53 [1] : vector<4x512xf32> to vector<4xf32>
    %109 = vector.shape_cast %108 : vector<4xf32> to vector<4x1xf32>
    %cst_54 = arith.constant 0.001953125 : f32
    %110 = vector.broadcast %cst_54 : f32 to vector<4x1xf32>
    %111 = arith.mulf %109, %110 : vector<4x1xf32>
    %cst_55 = arith.constant 9.99999974E-6 : f32
    %112 = vector.broadcast %cst_55 : f32 to vector<4x1xf32>
    %113 = arith.addf %111, %112 : vector<4x1xf32>
    %114 = math.rsqrt %113 : vector<4x1xf32>
    %115 = arith.mulf %99, %114 : vector<4x1xf32>
    %116 = vector.broadcast %115 : vector<4x1xf32> to vector<4x512xf32>
    %117 = arith.mulf %106, %116 : vector<4x512xf32>
    %118 = vector.broadcast %100 : vector<4x1xf32> to vector<4x512xf32>
    %119 = arith.addf %117, %118 : vector<4x512xf32>
    %cst_56 = arith.constant 0.000000e+00 : f32
    %120 = vector.broadcast %cst_56 : f32 to vector<4x512xf32>
    %121 = arith.maximumf %119, %120 : vector<4x512xf32>
    %c0_57 = arith.constant 0 : index
    %c0_58 = arith.constant 0 : index
    %122 = vector.load %arg11[%c0_57, %c0_58] : memref<4x512xf32, #tpu.memory_space<vmem>>, vector<4x512xf32>
    tpu.vector_store %arg11[%c0_57, %c0_58], %121 {strides = array<i32>} : memref<4x512xf32, #tpu.memory_space<vmem>>, vector<4x512xf32>,
    %c0_59 = arith.constant 0 : index
    %c0_60 = arith.constant 0 : index
    %123 = vector.load %arg6[%c0_59, %c0_60] : memref<8x36xbf16, #tpu.memory_space<vmem>>, vector<8x36xbf16>
    %c17_i32_61 = arith.constant 17 : i32
    %124 = tpu.dynamic_rotate %121 by %c17_i32_61 dim 1 : vector<4x512xf32>, i32 -> vector<4x512xf32>
    %c0_62 = arith.constant 0 : index
    %c0_63 = arith.constant 0 : index
    %125 = vector.load %arg2[%c0_62, %c0_63] : memref<9x512xf32, #tpu.memory_space<vmem>>, vector<1x512xf32>
    %126 = vector.broadcast %125 : vector<1x512xf32> to vector<4x512xf32>
    %127 = arith.mulf %124, %126 : vector<4x512xf32>
    %c16_i32_64 = arith.constant 16 : i32
    %128 = tpu.dynamic_rotate %121 by %c16_i32_64 dim 1 : vector<4x512xf32>, i32 -> vector<4x512xf32>
    %c1_65 = arith.constant 1 : index
    %c0_66 = arith.constant 0 : index
    %129 = vector.load %arg2[%c1_65, %c0_66] : memref<9x512xf32, #tpu.memory_space<vmem>>, vector<1x512xf32>
    %130 = vector.broadcast %129 : vector<1x512xf32> to vector<4x512xf32>
    %131 = arith.mulf %128, %130 : vector<4x512xf32>
    %c15_i32_67 = arith.constant 15 : i32
    %132 = tpu.dynamic_rotate %121 by %c15_i32_67 dim 1 : vector<4x512xf32>, i32 -> vector<4x512xf32>
    %c2_68 = arith.constant 2 : index
    %c0_69 = arith.constant 0 : index
    %133 = vector.load %arg2[%c2_68, %c0_69] : memref<9x512xf32, #tpu.memory_space<vmem>>, vector<1x512xf32>
    %134 = vector.broadcast %133 : vector<1x512xf32> to vector<4x512xf32>
    %135 = arith.mulf %132, %134 : vector<4x512xf32>
    %c1_i32_70 = arith.constant 1 : i32
    %136 = tpu.dynamic_rotate %121 by %c1_i32_70 dim 1 : vector<4x512xf32>, i32 -> vector<4x512xf32>
    %c3_71 = arith.constant 3 : index
    %c0_72 = arith.constant 0 : index
    %137 = vector.load %arg2[%c3_71, %c0_72] : memref<9x512xf32, #tpu.memory_space<vmem>>, vector<1x512xf32>
    %138 = vector.broadcast %137 : vector<1x512xf32> to vector<4x512xf32>
    %139 = arith.mulf %136, %138 : vector<4x512xf32>
    %c511_i32_73 = arith.constant 511 : i32
    %140 = tpu.dynamic_rotate %121 by %c511_i32_73 dim 1 : vector<4x512xf32>, i32 -> vector<4x512xf32>
    %c5_74 = arith.constant 5 : index
    %c0_75 = arith.constant 0 : index
    %141 = vector.load %arg2[%c5_74, %c0_75] : memref<9x512xf32, #tpu.memory_space<vmem>>, vector<1x512xf32>
    %142 = vector.broadcast %141 : vector<1x512xf32> to vector<4x512xf32>
    %143 = arith.mulf %140, %142 : vector<4x512xf32>
    %c497_i32_76 = arith.constant 497 : i32
    %144 = tpu.dynamic_rotate %121 by %c497_i32_76 dim 1 : vector<4x512xf32>, i32 -> vector<4x512xf32>
    %c6_77 = arith.constant 6 : index
    %c0_78 = arith.constant 0 : index
    %145 = vector.load %arg2[%c6_77, %c0_78] : memref<9x512xf32, #tpu.memory_space<vmem>>, vector<1x512xf32>
    %146 = vector.broadcast %145 : vector<1x512xf32> to vector<4x512xf32>
    %147 = arith.mulf %144, %146 : vector<4x512xf32>
    %c496_i32_79 = arith.constant 496 : i32
    %148 = tpu.dynamic_rotate %121 by %c496_i32_79 dim 1 : vector<4x512xf32>, i32 -> vector<4x512xf32>
    %c7_80 = arith.constant 7 : index
    %c0_81 = arith.constant 0 : index
    %149 = vector.load %arg2[%c7_80, %c0_81] : memref<9x512xf32, #tpu.memory_space<vmem>>, vector<1x512xf32>
    %150 = vector.broadcast %149 : vector<1x512xf32> to vector<4x512xf32>
    %151 = arith.mulf %148, %150 : vector<4x512xf32>
    %c495_i32_82 = arith.constant 495 : i32
    %152 = tpu.dynamic_rotate %121 by %c495_i32_82 dim 1 : vector<4x512xf32>, i32 -> vector<4x512xf32>
    %c8_83 = arith.constant 8 : index
    %c0_84 = arith.constant 0 : index
    %153 = vector.load %arg2[%c8_83, %c0_84] : memref<9x512xf32, #tpu.memory_space<vmem>>, vector<1x512xf32>
    %154 = vector.broadcast %153 : vector<1x512xf32> to vector<4x512xf32>
    %155 = arith.mulf %152, %154 : vector<4x512xf32>
    %156 = tpu.concatenate %127, %131, %135, %139, %121, %143, %147, %151, %155 in 0 : vector<4x512xf32>, vector<4x512xf32>, vector<4x512xf32>, vector<4x512xf32>, vector<4x512xf32>, vector<4x512xf32>, vector<4x512xf32>, vector<4x512xf32>, vector<4x512xf32> -> vector<36x512xf32>
    %157 = arith.truncf %156 : vector<36x512xf32> to vector<36x512xbf16>
    %cst_85 = arith.constant dense<0.000000e+00> : vector<8x512xf32>
    %158 = tpu.matmul %123, %157, %cst_85 {dimension_numbers = #tpu.dot_dimension_numbers<[1], [0], [0], [1], [0, 0, 1, 1], [], []>} : vector<8x36xbf16>, vector<36x512xbf16>, vector<8x512xf32> -> vector<8x512xf32>
    %159 = arith.truncf %158 : vector<8x512xf32> to vector<8x512xbf16>
    %cst_86 = arith.constant dense<0.000000e+00> : vector<8x128xf32>
    %160 = tpu.matmul %159, %0, %cst_86 {dimension_numbers = #tpu.dot_dimension_numbers<[1], [0], [0], [1], [0, 0, 1, 1], [], []>} : vector<8x512xbf16>, vector<512x128xbf16>, vector<8x128xf32> -> vector<8x128xf32>
    %161 = vector.extract_strided_slice %2 {offsets = [0, 0], sizes = [8, 1], strides = [1, 1]} : vector<8x4xf32> to vector<8x1xf32>
    %162 = vector.extract_strided_slice %2 {offsets = [0, 1], sizes = [8, 1], strides = [1, 1]} : vector<8x4xf32> to vector<8x1xf32>
    %cst_87 = arith.constant dense<0.000000e+00> : vector<8xf32>
    %163 = vector.multi_reduction <add>, %160, %cst_87 [1] : vector<8x128xf32> to vector<8xf32>
    %164 = vector.shape_cast %163 : vector<8xf32> to vector<8x1xf32>
    %cst_88 = arith.constant 7.812500e-03 : f32
    %165 = vector.broadcast %cst_88 : f32 to vector<8x1xf32>
    %166 = arith.mulf %164, %165 : vector<8x1xf32>
    %167 = vector.broadcast %166 : vector<8x1xf32> to vector<8x128xf32>
    %168 = arith.subf %160, %167 : vector<8x128xf32>
    %169 = arith.mulf %168, %168 : vector<8x128xf32>
    %cst_89 = arith.constant dense<0.000000e+00> : vector<8xf32>
    %170 = vector.multi_reduction <add>, %169, %cst_89 [1] : vector<8x128xf32> to vector<8xf32>
    %171 = vector.shape_cast %170 : vector<8xf32> to vector<8x1xf32>
    %cst_90 = arith.constant 7.812500e-03 : f32
    %172 = vector.broadcast %cst_90 : f32 to vector<8x1xf32>
    %173 = arith.mulf %171, %172 : vector<8x1xf32>
    %cst_91 = arith.constant 9.99999974E-6 : f32
    %174 = vector.broadcast %cst_91 : f32 to vector<8x1xf32>
    %175 = arith.addf %173, %174 : vector<8x1xf32>
    %176 = math.rsqrt %175 : vector<8x1xf32>
    %177 = arith.mulf %161, %176 : vector<8x1xf32>
    %178 = vector.broadcast %177 : vector<8x1xf32> to vector<8x128xf32>
    %179 = arith.mulf %168, %178 : vector<8x128xf32>
    %180 = vector.broadcast %162 : vector<8x1xf32> to vector<8x128xf32>
    %181 = arith.addf %179, %180 : vector<8x128xf32>
    %cst_92 = arith.constant 0.000000e+00 : f32
    %182 = vector.broadcast %cst_92 : f32 to vector<8x128xf32>
    %183 = arith.maximumf %181, %182 : vector<8x128xf32>
    %184 = vector.extract_strided_slice %37 {offsets = [16, 0], sizes = [8, 512], strides = [1, 1]} : vector<36x512xbf16> to vector<8x512xbf16>
    %185 = vector.extract_strided_slice %37 {offsets = [28, 0], sizes = [8, 512], strides = [1, 1]} : vector<36x512xbf16> to vector<8x512xbf16>
    %186 = tpu.concatenate %184, %185 in 0 : vector<8x512xbf16>, vector<8x512xbf16> -> vector<16x512xbf16>
    %c0_93 = arith.constant 0 : index
    %c0_94 = arith.constant 0 : index
    %187 = vector.load %arg7[%c0_93, %c0_94] : memref<8x16xbf16, #tpu.memory_space<vmem>>, vector<8x16xbf16>
    %cst_95 = arith.constant dense<0.000000e+00> : vector<8x512xf32>
    %188 = tpu.matmul %187, %186, %cst_95 {dimension_numbers = #tpu.dot_dimension_numbers<[1], [0], [0], [1], [0, 0, 1, 1], [], []>} : vector<8x16xbf16>, vector<16x512xbf16>, vector<8x512xf32> -> vector<8x512xf32>
    %189 = arith.truncf %188 : vector<8x512xf32> to vector<8x512xbf16>
    %cst_96 = arith.constant dense<0.000000e+00> : vector<8x128xf32>
    %190 = tpu.matmul %189, %0, %cst_96 {dimension_numbers = #tpu.dot_dimension_numbers<[1], [0], [0], [1], [0, 0, 1, 1], [], []>} : vector<8x512xbf16>, vector<512x128xbf16>, vector<8x128xf32> -> vector<8x128xf32>
    %191 = vector.extract_strided_slice %2 {offsets = [0, 2], sizes = [8, 1], strides = [1, 1]} : vector<8x4xf32> to vector<8x1xf32>
    %192 = vector.extract_strided_slice %2 {offsets = [0, 3], sizes = [8, 1], strides = [1, 1]} : vector<8x4xf32> to vector<8x1xf32>
    %cst_97 = arith.constant dense<0.000000e+00> : vector<8xf32>
    %193 = vector.multi_reduction <add>, %190, %cst_97 [1] : vector<8x128xf32> to vector<8xf32>
    %194 = vector.shape_cast %193 : vector<8xf32> to vector<8x1xf32>
    %cst_98 = arith.constant 7.812500e-03 : f32
    %195 = vector.broadcast %cst_98 : f32 to vector<8x1xf32>
    %196 = arith.mulf %194, %195 : vector<8x1xf32>
    %197 = vector.broadcast %196 : vector<8x1xf32> to vector<8x128xf32>
    %198 = arith.subf %190, %197 : vector<8x128xf32>
    %199 = arith.mulf %198, %198 : vector<8x128xf32>
    %cst_99 = arith.constant dense<0.000000e+00> : vector<8xf32>
    %200 = vector.multi_reduction <add>, %199, %cst_99 [1] : vector<8x128xf32> to vector<8xf32>
    %201 = vector.shape_cast %200 : vector<8xf32> to vector<8x1xf32>
    %cst_100 = arith.constant 7.812500e-03 : f32
    %202 = vector.broadcast %cst_100 : f32 to vector<8x1xf32>
    %203 = arith.mulf %201, %202 : vector<8x1xf32>
    %cst_101 = arith.constant 9.99999974E-6 : f32
    %204 = vector.broadcast %cst_101 : f32 to vector<8x1xf32>
    %205 = arith.addf %203, %204 : vector<8x1xf32>
    %206 = math.rsqrt %205 : vector<8x1xf32>
    %207 = arith.mulf %191, %206 : vector<8x1xf32>
    %208 = vector.broadcast %207 : vector<8x1xf32> to vector<8x128xf32>
    %209 = arith.mulf %198, %208 : vector<8x128xf32>
    %210 = vector.broadcast %192 : vector<8x1xf32> to vector<8x128xf32>
    %211 = arith.addf %209, %210 : vector<8x128xf32>
    %212 = arith.addf %183, %211 : vector<8x128xf32>
    %cst_102 = arith.constant 0.000000e+00 : f32
    %213 = vector.broadcast %cst_102 : f32 to vector<8x128xf32>
    %214 = arith.maximumf %212, %213 : vector<8x128xf32>
    %c0_103 = arith.constant 0 : index
    %c0_104 = arith.constant 0 : index
    %215 = vector.load %arg10[%c0_103, %c0_104] : memref<8x128xf32, #tpu.memory_space<vmem>>, vector<8x128xf32>
    tpu.vector_store %arg10[%c0_103, %c0_104], %214 {strides = array<i32>} : memref<8x128xf32, #tpu.memory_space<vmem>>, vector<8x128xf32>,
    return
  }
  func.func @transform_0(%arg0: i32) -> (i32, i32) {
    %c0_i32 = arith.constant 0 : i32
    %c0_i32_0 = arith.constant 0 : i32
    %c0_i32_1 = arith.constant 0 : i32
    return %c0_i32, %c0_i32_0 : i32, i32
  }
  func.func @transform_1(%arg0: i32) -> (i32, i32) {
    %c0_i32 = arith.constant 0 : i32
    %c0_i32_0 = arith.constant 0 : i32
    %c0_i32_1 = arith.constant 0 : i32
    return %c0_i32, %c0_i32_0 : i32, i32
  }
  func.func @transform_2(%arg0: i32) -> (i32, i32) {
    %c0_i32 = arith.constant 0 : i32
    %c0_i32_0 = arith.constant 0 : i32
    %c0_i32_1 = arith.constant 0 : i32
    return %c0_i32, %c0_i32_0 : i32, i32
  }
  func.func @transform_3(%arg0: i32) -> (i32, i32) {
    %c0_i32 = arith.constant 0 : i32
    %c0_i32_0 = arith.constant 0 : i32
    %c0_i32_1 = arith.constant 0 : i32
    return %c0_i32, %c0_i32_0 : i32, i32
  }
  func.func @transform_4(%arg0: i32) -> (i32, i32) {
    %c0_i32 = arith.constant 0 : i32
    %c0_i32_0 = arith.constant 0 : i32
    %c0_i32_1 = arith.constant 0 : i32
    return %c0_i32, %c0_i32_0 : i32, i32
  }
  func.func @transform_5(%arg0: i32) -> (i32, i32) {
    %c0_i32 = arith.constant 0 : i32
    %c0_i32_0 = arith.constant 0 : i32
    %c0_i32_1 = arith.constant 0 : i32
    return %c0_i32, %c0_i32_0 : i32, i32
  }
  func.func @transform_6(%arg0: i32) -> (i32, i32) {
    %c0_i32 = arith.constant 0 : i32
    %c0_i32_0 = arith.constant 0 : i32
    %c0_i32_1 = arith.constant 0 : i32
    return %c0_i32, %c0_i32_0 : i32, i32
  }
  func.func @transform_7(%arg0: i32) -> (i32, i32) {
    %c0_i32 = arith.constant 0 : i32
    %c0_i32_0 = arith.constant 0 : i32
    %c0_i32_1 = arith.constant 0 : i32
    return %c0_i32, %c0_i32_0 : i32, i32
  }
  func.func @transform_8(%arg0: i32) -> (i32, i32) {
    %c0_i32 = arith.constant 0 : i32
    %c0_i32_0 = arith.constant 0 : i32
    %c0_i32_1 = arith.constant 0 : i32
    return %c0_i32, %c0_i32_0 : i32, i32
  }
  func.func @transform_9(%arg0: i32) -> (i32, i32) {
    %c0_i32 = arith.constant 0 : i32
    %c0_i32_0 = arith.constant 0 : i32
    %c0_i32_1 = arith.constant 0 : i32
    return %c0_i32, %c0_i32_0 : i32, i32
  }
  func.func @transform_10(%arg0: i32) -> (i32, i32) {
    %c0_i32 = arith.constant 0 : i32
    %c0_i32_0 = arith.constant 0 : i32
    %c0_i32_1 = arith.constant 0 : i32
    return %c0_i32, %c0_i32_0 : i32, i32
  }
}

</mosaic_0001>

<bundles_post_ra>
// kernel: encoder_residual_block.1
= control target key start
LH: loop header
LB: loop body
LE: loop exit
PB: predicated region body
PF: predicated region fallthrough
CT: control target
= control target key end

     0   :  { %s2254_s15 = smov 1   ;;  %s2255_s16 = smov 16   ;;  %v3459_v4 = vmov 0   ;;  %v117_v5 = vlaneseq  ;;  %vm478_vm4 = vcmask 1043456   ;;  %vm512_vm9 = vcmask 1041408   ;;  %s3448_s0 = inlined_call_operand.vmem [shape: f32[4,512], index: 0, kind: input, shape index: {}]   ;;  %s3449_s1 = inlined_call_operand.vmem [shape: f32[9,512], index: 1, kind: input, shape index: {}]   ;;  %s3450_s3 = inlined_call_operand.vmem [shape: bf16[4,36], index: 3, kind: input, shape index: {}]   ;;  %s3451_s7 = inlined_call_operand.vmem [shape: f32[4,4], index: 7, kind: input, shape index: {}]   ;;  %s3452_s4 = inlined_call_operand.vmem [shape: bf16[4,36], index: 4, kind: input, shape index: {}]   ;;  %s3453_s10 = inlined_call_operand.vmem [shape: f32[4,512], index: 10, kind: output, shape index: {1}]   ;;  %s3454_s2 = inlined_call_operand.vmem [shape: bf16[512,128], index: 2, kind: input, shape index: {}]   ;;  %s3455_s5 = inlined_call_operand.vmem [shape: bf16[8,36], index: 5, kind: input, shape index: {}]   ;;  %s3456_s6 = inlined_call_operand.vmem [shape: bf16[8,16], index: 6, kind: input, shape index: {}]   ;;  %s3457_s8 = inlined_call_operand.vmem [shape: f32[8,4], index: 8, kind: input, shape index: {}]   ;;  %s3458_s9 = inlined_call_operand.vmem [shape: f32[8,128], index: 9, kind: output, shape index: {0}]  }
   0x1   :  { %v2324_v0 = vld [vmem:[%s3448_s0] sm:$0xff]  ;;  %v2337_v2 = vld [vmem:[%s3448_s0 + $0x8] sm:$0xff]  ;;  %s2256_s19 = smov 17   ;;  %s2257_s0 = smov 15   ;;  %557 = vmatprep.mubr.bf16.mxu0 %v3459_v4  ;;  %598 = vmatprep.mubr.bf16.mxu1 %v3459_v4  ;;  %vm1810_vm10 = vcmask 1045504   ;;  %vm508_vm11 = vcmask 293888  }
   0x2   :  { %230 = vrot.lane.b32.xlu1 %v2324_v0, %s2254_s15  ;;  %150 = vrot.lane.b32.xlu0 %v2324_v0, %s2255_s16  ;;  %v2332_v1 = vcombine.high %v2324_v0, %v2324_v0  ;;  %v2345_v3 = vcombine.high %v2337_v2, %v2337_v2  ;;  %s2258_s20 = smov 127   ;;  %s2259_s21 = smov 112   ;;  %v127_v8 = vshrl.u32 %v117_v5, 7  ;;  %v2406_v9 = vand.u32 127, %v117_v5 }
   0x3   :  { %s2260_s22 = smov 113   ;;  %2203 = vset.pattern.permute.xlu0 %v3459_v4  ;;  %s2262_s23 = smov 111   ;;  %v2045_v13 = vld [vmem:[%s3449_s1 + $0x3] ss:$8 sm:$0xf]  ;;  %vm1840_vm12 = vcmask 130048  }
   0x4   :  { %v2410_v12 = vsub.s32 1, %v127_v8  ;;  %v2043_v14 = vld [vmem:[%s3449_s1 + $0x1] ss:$8 sm:$0xf]  ;;  %vm238_vm0 = vcmp.lt.s32.totalorder %v2406_v9, 1  ;;  %vm158_vm1 = vcmp.lt.s32.totalorder %v2406_v9, 16 }
   0x5   :  { %v2423_v17 = vld [vmem:[%s3449_s1] ss:$8 sm:$0xf]  ;;  %vm119_vm2 = vcmp.lt.s32.totalorder %v2406_v9, 17  ;;  %v2448_v26 = vsub.s32 0, %v127_v8  ;;  %vm198_vm3 = vcmp.lt.s32.totalorder %v2406_v9, 15 }
   0x6   :  { %232 = vrot.lane.b32.xlu1 %v2332_v1, %s2254_s15  ;;  %152 = vrot.lane.b32.xlu0 %v2332_v1, %s2255_s16  ;;  %3470 = vst [vmem:[#allocation2_spill] sm:$0xff] %v2410_v12  ;;  %v2426_v18 = vrot.slane %v2045_v13, %v2410_v12  ;;  %v2429_v19 = vrot.slane %v2043_v14, %v2410_v12  ;;  %v2440_v22 = vld [vmem:[%s3449_s1 + $0x2] ss:$8 sm:$0xf]  ;;  %v2491_v52 = vsub.s32 2, %v127_v8  ;;  %v2493_v53 = vsub.s32 3, %v127_v8 }
   0x7   :  { %v2446_v24 = vrot.slane %v2423_v17, %v2410_v12  ;;  %3471 = vst [vmem:[#allocation3_spill] sm:$0xff] %v2448_v26  ;;  %v2458_v30 = vrot.slane %v2440_v22, %v2410_v12  ;;  %v2464_v34 = vrot.slane %v2045_v13, %v2448_v26  ;;  %v2470_v38 = vrot.slane %v2043_v14, %v2448_v26 }
   0x8   :  { %v2479_v43 = vrot.slane %v2423_v17, %v2448_v26  ;;  %v2489_v51 = vrot.slane %v2440_v22, %v2448_v26  ;;  %3472 = vst [vmem:[#allocation4_spill] sm:$0xff] %v2491_v52  ;;  %3473 = vst [vmem:[#allocation5_spill] sm:$0xff] %v2493_v53  ;;  %v2500_v61 = vrot.slane %v2043_v14, %v2491_v52  ;;  %vm278_vm5 = vcmp.lt.s32.totalorder %v2406_v9, 127 }
   0x9   :  { %v2503_v62 = vrot.slane %v2043_v14, %v2493_v53  ;;  %v2506_v63 = vrot.slane %v2045_v13, %v2491_v52  ;;  %vm358_vm6 = vcmp.lt.s32.totalorder %v2406_v9, 112  ;;  %vm318_vm7 = vcmp.lt.s32.totalorder %v2406_v9, 113 }
   0xa   :  { %236 = vrot.lane.b32.xlu1 %v2345_v3, %s2254_s15  ;;  %156 = vrot.lane.b32.xlu0 %v2345_v3, %s2255_s16  ;;  %vm398_vm8 = vcmp.lt.s32.totalorder %v2406_v9, 111 }
   0xe   :  { %111 = vrot.lane.b32.xlu1 %v2332_v1, %s2256_s19  ;;  %109 = vrot.lane.b32.xlu0 %v2324_v0, %s2256_s19 }
  0x12   :  { %192 = vrot.lane.b32.xlu1 %v2332_v1, %s2257_s0  ;;  %190 = vrot.lane.b32.xlu0 %v2324_v0, %s2257_s0 }
  0x16   :  { %154 = vrot.lane.b32.xlu1 %v2337_v2, %s2255_s16  ;;  %115 = vrot.lane.b32.xlu0 %v2345_v3, %s2256_s19 }
  0x1a   :  { %234 = vrot.lane.b32.xlu1 %v2337_v2, %s2254_s15  ;;  %196 = vrot.lane.b32.xlu0 %v2345_v3, %s2257_s0 }
  0x1e   :  { %274 = vrot.lane.b32.xlu1 %v2337_v2, %s2258_s20  ;;  %272 = vrot.lane.b32.xlu0 %v2332_v1, %s2258_s20 }
  0x22   :  { %354 = vrot.lane.b32.xlu1 %v2337_v2, %s2259_s21  ;;  %352 = vrot.lane.b32.xlu0 %v2332_v1, %s2259_s21 }
  0x26   :  { %194 = vrot.lane.b32.xlu1 %v2337_v2, %s2257_s0  ;;  %113 = vrot.lane.b32.xlu0 %v2337_v2, %s2256_s19 }
  0x2a   :  { %350 = vrot.lane.b32.xlu1 %v2324_v0, %s2259_s21  ;;  %270 = vrot.lane.b32.xlu0 %v2324_v0, %s2258_s20 }
  0x2e   :  { %314 = vrot.lane.b32.xlu1 %v2337_v2, %s2260_s22  ;;  %312 = vrot.lane.b32.xlu0 %v2332_v1, %s2260_s22 }
  0x32   :  { %310 = vrot.lane.b32.xlu1 %v2324_v0, %s2260_s22  ;;  %276 = vrot.lane.b32.xlu0 %v2345_v3, %s2258_s20 }
  0x36   :  { %316 = vrot.lane.b32.xlu1 %v2345_v3, %s2260_s22  ;;  %356 = vrot.lane.b32.xlu0 %v2345_v3, %s2259_s21 }
  0x3a   :  { %392 = vrot.lane.b32.xlu1 %v2332_v1, %s2262_s23  ;;  %390 = vrot.lane.b32.xlu0 %v2324_v0, %s2262_s23 }
  0x3e   :  { %396 = vrot.lane.b32.xlu1 %v2345_v3, %s2262_s23  ;;  %394 = vrot.lane.b32.xlu0 %v2337_v2, %s2262_s23 }
  0x74   :  { %v231_v6 = vpop.permute.xlu1 %230  ;;  %v151_v7 = vpop.permute.xlu0 %150 }
  0x78   :  { %v2408_v10 = vpop.permute.xlu1 %232  ;;  %v153_v11 = vpop.permute.xlu0 %152 }
  0x79   :  { %v241_v20 = vsel %vm238_vm0, %v231_v6, %v2408_v10  ;;  %v161_v21 = vsel %vm158_vm1, %v151_v7, %v153_v11 }
  0x7a   :  { %v267_v28 = vmul.f32 %v2426_v18, %v241_v20  ;;  %v187_v29 = vmul.f32 %v2429_v19, %v161_v21 }
  0x7c   :  { %v237_v15 = vpop.permute.xlu1 %236  ;;  %v157_v16 = vpop.permute.xlu0 %156  ;;  %v447_v36 = vrot.slane %v267_v28, 4  ;;  %v435_v37 = vrot.slane %v187_v29, 4 }
  0x7d   :  { %v242_v40 = vsel %vm238_vm0, %v237_v15, %v231_v6  ;;  %v162_v41 = vsel %vm158_vm1, %v157_v16, %v151_v7  ;;  %v2511_v6 = vrot.slane %v2045_v13, %v2493_v53 }
  0x7e   :  { %v266_v49 = vmul.f32 %v2464_v34, %v242_v40  ;;  %v186_v50 = vmul.f32 %v2470_v38, %v162_v41 }
  0x80   :  { %v2442_v23 = vpop.permute.xlu1 %111  ;;  %v110_v25 = vpop.permute.xlu0 %109  ;;  %v446_v58 = vrot.slane %v266_v49, 4  ;;  %v434_v59 = vrot.slane %v186_v50, 4 }
  0x81   :  { %v122_v27 = vsel %vm119_vm2, %v110_v25, %v2442_v23 }
  0x82   :  { %v147_v31 = vmul.f32 %v2446_v24, %v122_v27 }
  0x84   :  { %v2461_v32 = vpop.permute.xlu1 %192  ;;  %v191_v33 = vpop.permute.xlu0 %190  ;;  %v480_v45 = vsel %vm478_vm4, %v147_v31, %v435_v37  ;;  %v2549_v37 = vrot.slane %v2423_v17, %v2491_v52 }
  0x85   :  { %v201_v35 = vsel %vm198_vm3, %v191_v33, %v2461_v32 }
  0x86   :  { %v227_v39 = vmul.f32 %v2458_v30, %v201_v35  ;;  %v2541_v35 = vrot.slane %v2440_v22, %v2491_v52 }
  0x88   :  { %v155_v42 = vpop.permute.xlu1 %154  ;;  %v116_v44 = vpop.permute.xlu0 %115  ;;  %v484_v46 = vsel %vm478_vm4, %v227_v39, %v447_v36  ;;  %v2545_v36 = vrot.slane %v2440_v22, %v2493_v53  ;;  %v2553_v39 = vrot.slane %v2423_v17, %v2493_v53 }
  0x89   :  { %v123_v47 = vsel %vm119_vm2, %v116_v44, %v110_v25  ;;  %v496_v48 = vpack.c.bf16 %v484_v46, %v480_v45  ;;  %v160_v5 = vsel %vm158_vm1, %v153_v11, %v155_v42  ;;  %v159_v14 = vsel %vm158_vm1, %v155_v42, %v157_v16  ;;  %v2046_v16 = vld [vmem:[%s3449_s1 + $0x5] ss:$8 sm:$0xf] }
  0x8a   :  { %v146_v54 = vmul.f32 %v2479_v43, %v123_v47  ;;  %v188_v13 = vmul.f32 %v2500_v61, %v160_v5  ;;  %v189_v28 = vmul.f32 %v2503_v62, %v159_v14  ;;  %v2556_v41 = vrot.slane %v2046_v16, %v2410_v12 }
  0x8b   :  { %525 = vmatprep.subr.bf16.mxu0 %v496_v48 }
  0x8c   :  { %v235_v55 = vpop.permute.xlu1 %234  ;;  %v197_v56 = vpop.permute.xlu0 %196  ;;  %v479_v20 = vsel %vm478_vm4, %v146_v54, %v434_v59  ;;  %v436_v40 = vrot.slane %v188_v13, 4  ;;  %v437_v22 = vrot.slane %v189_v28, 4 }
  0x8d   :  { %v202_v57 = vsel %vm198_vm3, %v197_v56, %v191_v33  ;;  %v239_v25 = vsel %vm238_vm0, %v235_v55, %v237_v15  ;;  %v240_v11 = vsel %vm238_vm0, %v2408_v10, %v235_v55  ;;  %v2536_v10 = vld [vmem:[%s3449_s1 + $0x7] ss:$8 sm:$0xf] }
  0x8e   :  { %v226_v60 = vmul.f32 %v2489_v51, %v202_v57  ;;  %v268_v29 = vmul.f32 %v2506_v63, %v240_v11  ;;  %v269_v31 = vmul.f32 %v2511_v6, %v239_v25  ;;  %v2561_v42 = vrot.slane %v2536_v10, %v2410_v12 }
  0x90   :  { %v2513_v7 = vpop.permute.xlu1 %274  ;;  %v273_v8 = vpop.permute.xlu0 %272  ;;  %v483_v21 = vsel %vm478_vm4, %v226_v60, %v446_v58  ;;  %v448_v45 = vrot.slane %v268_v29, 4  ;;  %v449_v46 = vrot.slane %v269_v31, 4  ;;  %v2599_v31 = vrot.slane %v2046_v16, %v2448_v26 }
  0x91   :  { %v495_v27 = vpack.c.bf16 %v483_v21, %v479_v20  ;;  %v280_v47 = vsel %vm278_vm5, %v273_v8, %v2513_v7 }
  0x93   :  { %526 = vmatpush1.bf16.msra.mxu0 %v495_v27 }
  0x94   :  { %v2531_v33 = vpop.permute.xlu1 %354  ;;  %v353_v15 = vpop.permute.xlu0 %352 }
  0x98   :  { %v195_v48 = vpop.permute.xlu1 %194  ;;  %v114_v17 = vpop.permute.xlu0 %113 }
  0x99   :  { %v199_v49 = vsel %vm198_vm3, %v195_v48, %v197_v56  ;;  %v200_v50 = vsel %vm198_vm3, %v2461_v32, %v195_v48  ;;  %v120_v54 = vsel %vm119_vm2, %v114_v17, %v116_v44  ;;  %v121_v55 = vsel %vm119_vm2, %v2442_v23, %v114_v17  ;;  %v2047_v23 = vld [vmem:[%s3449_s1 + $0x6] ss:$8 sm:$0xf] }
  0x9a   :  { %v228_v57 = vmul.f32 %v2541_v35, %v200_v50  ;;  %v229_v58 = vmul.f32 %v2545_v36, %v199_v49  ;;  %v148_v59 = vmul.f32 %v2549_v37, %v121_v55  ;;  %v149_v60 = vmul.f32 %v2553_v39, %v120_v54 }
  0x9b   :  { %v307_v56 = vmul.f32 %v2556_v41, %v280_v47  ;;  %v360_v32 = vsel %vm358_vm6, %v353_v15, %v2531_v33  ;;  %v2586_v44 = vrot.slane %v2536_v10, %v2448_v26  ;;  %v2611_v17 = vrot.slane %v2047_v23, %v2448_v26 }
  0x9c   :  { %v351_v5 = vpop.permute.xlu1 %350  ;;  %v271_v20 = vpop.permute.xlu0 %270  ;;  %v482_v21 = vsel %vm478_vm4, %v149_v60, %v437_v22  ;;  %v486_v14 = vsel %vm478_vm4, %v229_v58, %v449_v46  ;;  %v481_v25 = vsel %vm478_vm4, %v148_v59, %v436_v40  ;;  %v485_v11 = vsel %vm478_vm4, %v228_v57, %v448_v45 }
  0x9d   :  { %v361_v27 = vsel %vm358_vm6, %v351_v5, %v353_v15  ;;  %v498_v13 = vpack.c.bf16 %v486_v14, %v482_v21  ;;  %v497_v28 = vpack.c.bf16 %v485_v11, %v481_v25  ;;  %v387_v29 = vmul.f32 %v2561_v42, %v360_v32 }
  0x9e   :  { %v2603_v22 = vrot.slane %v2047_v23, %v2410_v12  ;;  %v281_v40 = vsel %vm278_vm5, %v271_v20, %v273_v8  ;;  %v459_v45 = vrot.slane %v307_v56, 4  ;;  %v386_v46 = vmul.f32 %v2586_v44, %v361_v27 }
  0x9f   :  { %566 = vmatprep.subr.bf16.mxu1 %v498_v13  ;;  %v2614_v49 = vrot.slane %v2046_v16, %v2491_v52  ;;  %v471_v50 = vrot.slane %v387_v29, 4  ;;  %v306_v54 = vmul.f32 %v2599_v31, %v281_v40  ;;  %v2619_v55 = vrot.slane %v2046_v16, %v2493_v53 }
  0xa0   :  { %v315_v15 = vpop.permute.xlu1 %314  ;;  %567 = vmatpush1.bf16.msra.mxu1 %v497_v28  ;;  %v313_v47 = vpop.permute.xlu0 %312  ;;  %v2623_v57 = vrot.slane %v2536_v10, %v2491_v52  ;;  %v470_v58 = vrot.slane %v386_v46, 4  ;;  %v488_v56 = vsel %vm478_vm4, %v2332_v1, %v459_v45  ;;  %v2630_v21 = vrot.slane %v2536_v10, %v2493_v53  ;;  %v2049_v1 = vld [vmem:[%s3449_s1 + $0x20] ss:$8 sm:$0xf] }
  0xa1   :  { %v320_v48 = vsel %vm318_vm7, %v313_v47, %v315_v15  ;;  %v458_v27 = vrot.slane %v306_v54, 4 }
  0xa2   :  { %v347_v8 = vmul.f32 %v2603_v22, %v320_v48 }
  0xa4   :  { %v311_v59 = vpop.permute.xlu1 %310  ;;  %v277_v60 = vpop.permute.xlu0 %276  ;;  %v492_v32 = vsel %vm478_vm4, %v347_v8, %v471_v50 }
  0xa5   :  { %v321_v16 = vsel %vm318_vm7, %v311_v59, %v313_v47  ;;  %v279_v14 = vsel %vm278_vm5, %v2513_v7, %v277_v60  ;;  %v282_v25 = vsel %vm278_vm5, %v277_v60, %v271_v20  ;;  %v2639_v11 = vpack.c.bf16 %v492_v32, %v488_v56 }
  0xa6   :  { %v346_v10 = vmul.f32 %v2611_v17, %v321_v16  ;;  %v308_v13 = vmul.f32 %v2614_v49, %v279_v14  ;;  %v309_v28 = vmul.f32 %v2619_v55, %v282_v25  ;;  %v2649_v7 = vrot.slane %v2047_v23, %v2491_v52 }
  0xa7   :  { %527 = vmatprep.subr.bf16.mxu0 %v2639_v11  ;;  %v2652_v20 = vrot.slane %v2047_v23, %v2493_v53  ;;  %v2657_v47 = vrot.slane %v2049_v1, %v2448_v26  ;;  %v487_v56 = vsel %vm478_vm4, %v2324_v0, %v458_v27  ;;  %v2683_v0 = vrot.slane %v2049_v1, %v2491_v52 }
  0xa8   :  { %v461_v29 = vrot.slane %v309_v28, 4  ;;  %v317_v40 = vpop.permute.xlu1 %316  ;;  %v357_v45 = vpop.permute.xlu0 %356  ;;  %v491_v46 = vsel %vm478_vm4, %v346_v10, %v470_v58  ;;  %v460_v8 = vrot.slane %v308_v13, 4  ;;  %v2680_v13 = vrot.slane %v2049_v1, %v2410_v12 }
  0xa9   :  { %v319_v48 = vsel %vm318_vm7, %v315_v15, %v317_v40  ;;  %v322_v50 = vsel %vm318_vm7, %v317_v40, %v311_v59  ;;  %v359_v23 = vsel %vm358_vm6, %v2531_v33, %v357_v45  ;;  %v362_v54 = vsel %vm358_vm6, %v357_v45, %v351_v5 }
  0xaa   :  { %v388_v58 = vmul.f32 %v2623_v57, %v359_v23  ;;  %v389_v60 = vmul.f32 %v2630_v21, %v362_v54  ;;  %v499_v32 = vpack.c.bf16 %v491_v46, %v487_v56  ;;  %v2673_v15 = vrot.slane %v2049_v1, %v2493_v53 }
  0xab   :  { %v348_v59 = vmul.f32 %v2649_v7, %v319_v48  ;;  %v349_v16 = vmul.f32 %v2652_v20, %v322_v50  ;;  %v490_v27 = vsel %vm478_vm4, %v2345_v3, %v461_v29  ;;  %v489_v45 = vsel %vm478_vm4, %v2337_v2, %v460_v8 }
  0xac   :  { %v472_v33 = vrot.slane %v388_v58, 4  ;;  %v473_v14 = vrot.slane %v389_v60, 4  ;;  %v393_v25 = vpop.permute.xlu1 %392  ;;  %v391_v5 = vpop.permute.xlu0 %390  ;;  %528 = vmatpush1.bf16.msra.mxu0 %v499_v32  ;;  %v1811_v1 = vrot.slane %v499_v32, 2 }
  0xad   :  { %v401_v10 = vsel %vm398_vm8, %v391_v5, %v393_v25 }
  0xae   :  { %v426_v28 = vmul.f32 %v2657_v47, %v401_v10  ;;  %v494_v40 = vsel %vm478_vm4, %v349_v16, %v473_v14  ;;  %v493_v46 = vsel %vm478_vm4, %v348_v59, %v472_v33  ;;  %v1814_v16 = vrot.slane %v2639_v11, 2 }
  0xaf   :  { %v502_v48 = vpack.c.bf16 %v494_v40, %v490_v27  ;;  %v501_v50 = vpack.c.bf16 %v493_v46, %v489_v45 }
  0xb0   :  { %v503_v23 = vpack.c.bf16 %v426_v28, %v426_v28  ;;  %v397_v54 = vpop.permute.xlu1 %396  ;;  %v395_v58 = vpop.permute.xlu0 %394 }
  0xb1   :  { %v402_v3 = vsel %vm398_vm8, %v397_v54, %v391_v5  ;;  %v399_v29 = vsel %vm398_vm8, %v395_v58, %v397_v54  ;;  %v400_v60 = vsel %vm398_vm8, %v393_v25, %v395_v58  ;;  %568 = vmatprep.subr.bf16.mxu1 %v502_v48  ;;  %v1817_v27 = vrot.slane %v501_v50, 2 }
  0xb2   :  { %v1812_v2 = vrot.slane %v503_v23, 2  ;;  %v429_v8 = vmul.f32 %v2673_v15, %v402_v3  ;;  %v427_v56 = vmul.f32 %v2680_v13, %v400_v60  ;;  %v428_v59 = vmul.f32 %v2683_v0, %v399_v29  ;;  %569 = vmatpush1.bf16.msra.mxu1 %v501_v50 }
  0xb3   :  { %v514_v28 = vsel %vm512_vm9, %v503_v23, 0  ;;  %v1820_v25 = vrot.slane %v502_v48, 2 }
  0xb4   :  { %v506_v33 = vpack.c.bf16 %v429_v8, %v429_v8  ;;  %v504_v14 = vpack.c.bf16 %v427_v56, %v427_v56  ;;  %v505_v5 = vpack.c.bf16 %v428_v59, %v428_v59  ;;  %v1813_v10 = vsel %vm1810_vm10, %v1811_v1, %v1812_v2  ;;  %v507_v1 = vld [vmem:[%s3450_s3] sm:$0x3] }
  0xb5   :  { %v2705_v40 = vsel %vm478_vm4, %v499_v32, %v1813_v10 }
  0xb6   :  { %3474 = vst [vmem:[#allocation6_spill] sm:$0xff] %v2705_v40  ;;  %v1821_v45 = vrot.slane %v506_v33, 2  ;;  %v1815_v46 = vrot.slane %v504_v14, 2  ;;  %v1818_v54 = vrot.slane %v505_v5, 2  ;;  %2050 = vmatprep.subr.msk.bf16.mxu0 %vm512_vm9, %v504_v14  ;;  %2052 = vmatprep.subr.msk.bf16.mxu1 %vm512_vm9, %v506_v33  ;;  %v520_v58 = vsel %vm512_vm9, %v505_v5, 0 }
  0xb7   :  { %530 = vmatpush1.bf16.msra.mxu0 %v514_v28  ;;  %571 = vmatpush1.bf16.msra.mxu1 %v520_v58 }
  0xb8   :  { %v1816_v23 = vsel %vm1810_vm10, %v1814_v16, %v1815_v46  ;;  %v1822_v32 = vsel %vm1810_vm10, %v1820_v25, %v1821_v45  ;;  %v1819_v3 = vsel %vm1810_vm10, %v1817_v27, %v1818_v54 }
  0xb9   :  { %v2718_v29 = vsel %vm478_vm4, %v2639_v11, %v1816_v23  ;;  %v2721_v60 = vsel %vm478_vm4, %v502_v48, %v1822_v32  ;;  %v2724_v2 = vsel %vm478_vm4, %v501_v50, %v1819_v3 }
  0xba   :  { %3475 = vst [vmem:[#allocation7_spill] sm:$0xff] %v2718_v29  ;;  %3476 = vst [vmem:[#allocation8_spill] sm:$0xff] %v2721_v60  ;;  %2051 = vmatmul.mubr.msk.bf16.vlgmr.msra.gmra.mrb[0].mxu0 %vm508_vm11, %v507_v1  ;;  %2053 = vmatmul.mubr.msk.bf16.vlgmr.msra.gmra.mrb[0].mxu1 %vm508_vm11, %v507_v1 }
  0xbb   :  { %3477 = vst [vmem:[#allocation9_spill] sm:$0xff] %v2724_v2  ;;  %912 = vmatprep.mubr.bf16.mxu0 %v3459_v4  ;;  %953 = vmatprep.mubr.bf16.mxu1 %v3459_v4 }
 0x18d   :  { %v559_v8 = vpop.f32.mrb[0].mxu0  ;;  %v600_v56 = vpop.f32.mrb[0].mxu1 }
 0x18e   :  { %v607_v59 = vsel %vm478_vm4, %v559_v8, 0.0  ;;  %v561_v11 = vpop.f32.mrb[1].mxu0  ;;  %v602_v16 = vpop.f32.mrb[1].mxu1  ;;  %v610_v48 = vsel %vm478_vm4, %v600_v56, 0.0 }
 0x18f   :  { %v608_v33 = vsel %vm478_vm4, %v561_v11, 0.0  ;;  %v563_v50 = vpop.f32.mrb[2].mxu0  ;;  %v604_v14 = vpop.f32.mrb[2].mxu1  ;;  %v612_v25 = vsel %vm478_vm4, %v602_v16, 0.0 }
 0x190   :  { %v609_v5 = vadd.f32 %v608_v33, %v607_v59  ;;  %v564_v10 = vpop.f32.mrb[3].mxu0  ;;  %v605_v27 = vpop.f32.mrb[3].mxu1 }
 0x192   :  { %v611_v28 = vadd.f32 %v610_v48, %v609_v5 }
 0x194   :  { %v613_v45 = vadd.f32 %v612_v25, %v611_v28 }
 0x196   :  { %614 = vadd.xlane.f32.xlu0 %v613_v45 }
 0x223   :  { %v615_v46 = vpop.xlane.xlu0 %614 }
 0x224   :  { %v616_v54 = vmul.f32 0.001953125, %v615_v46 }
 0x226   :  { %v617_v58 = vsub.f32 %v559_v8, %v616_v54  ;;  %v618_v1 = vsub.f32 %v561_v11, %v616_v54  ;;  %v619_v23 = vsub.f32 %v600_v56, %v616_v54  ;;  %v620_v32 = vsub.f32 %v602_v16, %v616_v54  ;;  %v2741_v8 = vld [vmem:[%s3451_s7] sm:$0xf] }
 0x227   :  { %v3461_v56 = vmov 1  }
 0x228   :  { %v621_v3 = vmul.f32 %v617_v58, %v617_v58  ;;  %v622_v4 = vmul.f32 %v618_v1, %v618_v1  ;;  %v623_v2 = vmul.f32 %v619_v23, %v619_v23  ;;  %v624_v40 = vmul.f32 %v620_v32, %v620_v32  ;;  %2204 = vset.pattern.permute.xlu1 %v3461_v56 }
 0x22a   :  { %v625_v50 = vsel %vm478_vm4, %v621_v3, 0.0  ;;  %v626_v59 = vsel %vm478_vm4, %v622_v4, 0.0  ;;  %v628_v48 = vsel %vm478_vm4, %v623_v2, 0.0  ;;  %v630_v5 = vsel %vm478_vm4, %v624_v40, 0.0 }
 0x22b   :  { %v627_v33 = vadd.f32 %v626_v59, %v625_v50 }
 0x22d   :  { %v629_v14 = vadd.f32 %v628_v48, %v627_v33 }
 0x22f   :  { %v631_v10 = vadd.f32 %v630_v5, %v629_v14 }
 0x231   :  { %632 = vadd.xlane.f32.xlu1 %v631_v10 }
 0x242   :  { %649 = vperm.xlu1 %2204, %v2741_v8  }
 0x2be   :  { %v633_v11 = vpop.xlane.xlu1 %632 }
 0x2bf   :  { %v634_v4 = vmul.f32 0.001953125, %v633_v11 }
 0x2c1   :  { %v635_v16 = vadd.f32 1e-05, %v634_v4 }
 0x2c2   :  { %v650_v28 = vpop.permute.xlu1 %649 }
 0x2c3   :  { %2246 = vrsqrt.f32 %v635_v16 }
 0x2cd   :  { %v2247_v2 = vpop.eup %2246 }
 0x2ce   :  { %v637_v27 = vmul.f32 %v2247_v2, %v2741_v8 }
 0x2d0   :  { %640 = vperm.xlu0 %2203, %v637_v27  }
 0x34f   :  { %v641_v40 = vpop.permute.xlu0 %640 }
 0x350   :  { %v643_v25 = vmul.f32 %v641_v40, %v617_v58  ;;  %v644_v45 = vmul.f32 %v641_v40, %v618_v1  ;;  %v646_v54 = vmul.f32 %v641_v40, %v620_v32  ;;  %v645_v1 = vmul.f32 %v641_v40, %v619_v23 }
 0x352   :  { %v652_v46 = vadd.f32 %v650_v28, %v643_v25  ;;  %v653_v3 = vadd.f32 %v650_v28, %v644_v45  ;;  %v655_v59 = vadd.f32 %v650_v28, %v646_v54  ;;  %v654_v32 = vadd.f32 %v650_v28, %v645_v1 }
 0x354   :  { %v2746_v50 = vmax.f32 %v652_v46, 0.0  ;;  %v2752_v33 = vmax.f32 %v653_v3, 0.0  ;;  %v2758_v58 = vmax.f32 %v655_v59, 0.0  ;;  %v2776_v48 = vmax.f32 %v654_v32, 0.0 }
 0x356   :  { %661 = vrot.lane.b32.xlu0 %v2746_v50, %s2256_s19  ;;  %677 = vrot.lane.b32.xlu1 %v2746_v50, %s2255_s16 }
 0x35a   :  { %693 = vrot.lane.b32.xlu0 %v2746_v50, %s2257_s0  ;;  %679 = vrot.lane.b32.xlu1 %v2752_v33, %s2255_s16 }
 0x35e   :  { %667 = vrot.lane.b32.xlu0 %v2758_v58, %s2256_s19  ;;  %709 = vrot.lane.b32.xlu1 %v2746_v50, %s2254_s15 }
 0x362   :  { %699 = vrot.lane.b32.xlu0 %v2758_v58, %s2257_s0  ;;  %711 = vrot.lane.b32.xlu1 %v2752_v33, %s2254_s15 }
 0x366   :  { %727 = vrot.lane.b32.xlu0 %v2752_v33, %s2258_s20  ;;  %683 = vrot.lane.b32.xlu1 %v2758_v58, %s2255_s16 }
 0x36a   :  { %759 = vrot.lane.b32.xlu0 %v2752_v33, %s2259_s21  ;;  %715 = vrot.lane.b32.xlu1 %v2758_v58, %s2254_s15 }
 0x36e   :  { %665 = vrot.lane.b32.xlu0 %v2776_v48, %s2256_s19  ;;  %663 = vrot.lane.b32.xlu1 %v2752_v33, %s2256_s19 }
 0x372   :  { %725 = vrot.lane.b32.xlu0 %v2746_v50, %s2258_s20  ;;  %695 = vrot.lane.b32.xlu1 %v2752_v33, %s2257_s0 }
 0x376   :  { %743 = vrot.lane.b32.xlu0 %v2752_v33, %s2260_s22  ;;  %681 = vrot.lane.b32.xlu1 %v2776_v48, %s2255_s16 }
 0x37a   :  { %731 = vrot.lane.b32.xlu0 %v2758_v58, %s2258_s20  ;;  %713 = vrot.lane.b32.xlu1 %v2776_v48, %s2254_s15 }
 0x37e   :  { %763 = vrot.lane.b32.xlu0 %v2758_v58, %s2259_s21  ;;  %729 = vrot.lane.b32.xlu1 %v2776_v48, %s2258_s20 }
 0x382   :  { %773 = vrot.lane.b32.xlu0 %v2746_v50, %s2262_s23  ;;  %761 = vrot.lane.b32.xlu1 %v2776_v48, %s2259_s21 }
 0x386   :  { %777 = vrot.lane.b32.xlu0 %v2776_v48, %s2262_s23  ;;  %697 = vrot.lane.b32.xlu1 %v2776_v48, %s2257_s0 }
 0x38a   :  { %757 = vrot.lane.b32.xlu1 %v2746_v50, %s2259_s21 }
 0x38e   :  { %745 = vrot.lane.b32.xlu1 %v2776_v48, %s2260_s22 }
 0x392   :  { %741 = vrot.lane.b32.xlu1 %v2746_v50, %s2260_s22 }
 0x396   :  { %747 = vrot.lane.b32.xlu1 %v2758_v58, %s2260_s22 }
 0x39a   :  { %775 = vrot.lane.b32.xlu1 %v2752_v33, %s2262_s23 }
 0x39e   :  { %779 = vrot.lane.b32.xlu1 %v2758_v58, %s2262_s23 }
 0x3c8   :  { %v662_v23 = vpop.permute.xlu0 %661  ;;  %v678_v14 = vpop.permute.xlu1 %677 }
 0x3cc   :  { %v694_v5 = vpop.permute.xlu0 %693  ;;  %v680_v10 = vpop.permute.xlu1 %679 }
 0x3cd   :  { %v687_v46 = vsel %vm158_vm1, %v678_v14, %v680_v10 }
 0x3ce   :  { %v690_v56 = vmul.f32 %v687_v46, %v2429_v19 }
 0x3d0   :  { %v668_v11 = vpop.permute.xlu0 %667  ;;  %v710_v4 = vpop.permute.xlu1 %709  ;;  %v794_v46 = vrot.slane %v690_v56, 4 }
 0x3d4   :  { %v712_v16 = vpop.permute.xlu1 %711  ;;  %v700_v2 = vpop.permute.xlu0 %699 }
 0x3d5   :  { %v719_v54 = vsel %vm238_vm0, %v710_v4, %v712_v16  ;;  %v704_v60 = vsel %vm198_vm3, %v700_v2, %v694_v5 }
 0x3d6   :  { %v722_v29 = vmul.f32 %v719_v54, %v2426_v18 }
 0x3d8   :  { %v684_v27 = vpop.permute.xlu1 %683  ;;  %v2818_v40 = vpop.permute.xlu0 %727  ;;  %v806_v52 = vrot.slane %v722_v29, 4 }
 0x3d9   :  { %v688_v45 = vsel %vm158_vm1, %v684_v27, %v678_v14 }
 0x3da   :  { %v689_v1 = vmul.f32 %v688_v45, %v2470_v38  ;;  %v705_v38 = vmul.f32 %v704_v60, %v2489_v51 }
 0x3dc   :  { %v716_v28 = vpop.permute.xlu1 %715  ;;  %v2836_v53 = vpop.permute.xlu0 %759  ;;  %v793_v45 = vrot.slane %v689_v1, 4 }
 0x3dd   :  { %v720_v25 = vsel %vm238_vm0, %v716_v28, %v710_v4  ;;  %v672_v4 = vsel %vm119_vm2, %v668_v11, %v662_v23 }
 0x3de   :  { %v721_v3 = vmul.f32 %v720_v25, %v2464_v34  ;;  %v673_v18 = vmul.f32 %v672_v4, %v2479_v43 }
 0x3e0   :  { %v664_v59 = vpop.permute.xlu1 %663  ;;  %v805_v14 = vrot.slane %v721_v3, 4  ;;  %v666_v3 = vpop.permute.xlu0 %665  ;;  %v837_v51 = vsel %vm478_vm4, %v673_v18, %v793_v45 }
 0x3e1   :  { %v671_v32 = vsel %vm119_vm2, %v662_v23, %v664_v59 }
 0x3e2   :  { %v674_v34 = vmul.f32 %v671_v32, %v2446_v24  ;;  %v841_v54 = vsel %vm478_vm4, %v705_v38, %v805_v14  ;;  %v669_v38 = vsel %vm119_vm2, %v666_v3, %v668_v11 }
 0x3e3   :  { %v853_v1 = vpack.c.bf16 %v841_v54, %v837_v51 }
 0x3e4   :  { %v696_v25 = vpop.permute.xlu1 %695  ;;  %v838_v23 = vsel %vm478_vm4, %v674_v34, %v794_v46  ;;  %v726_v29 = vpop.permute.xlu0 %725 }
 0x3e5   :  { %v703_v19 = vsel %vm198_vm3, %v694_v5, %v696_v25 }
 0x3e6   :  { %v706_v26 = vmul.f32 %v703_v19, %v2458_v30 }
 0x3e8   :  { %v682_v12 = vpop.permute.xlu1 %681  ;;  %v842_v24 = vsel %vm478_vm4, %v706_v26, %v806_v52  ;;  %v744_v14 = vpop.permute.xlu0 %743 }
 0x3e9   :  { %v854_v60 = vpack.c.bf16 %v842_v24, %v838_v23  ;;  %v686_v30 = vsel %vm158_vm1, %v680_v10, %v682_v12  ;;  %v685_v5 = vsel %vm158_vm1, %v682_v12, %v684_v27  ;;  %v670_v10 = vsel %vm119_vm2, %v664_v59, %v666_v3 }
 0x3ea   :  { %v691_v32 = vmul.f32 %v686_v30, %v2500_v61  ;;  %v692_v4 = vmul.f32 %v685_v5, %v2503_v62 }
 0x3eb   :  { %880 = vmatprep.subr.bf16.mxu0 %v854_v60 }
 0x3ec   :  { %881 = vmatpush1.bf16.msra.mxu0 %v853_v1  ;;  %v714_v56 = vpop.permute.xlu1 %713  ;;  %v795_v27 = vrot.slane %v691_v32, 4  ;;  %v796_v45 = vrot.slane %v692_v4, 4 }
 0x3ed   :  { %v717_v26 = vsel %vm238_vm0, %v714_v56, %v716_v28  ;;  %v718_v52 = vsel %vm238_vm0, %v712_v16, %v714_v56  ;;  %v676_v28 = vmul.f32 %v669_v38, %v2553_v39  ;;  %v675_v16 = vmul.f32 %v670_v10, %v2549_v37 }
 0x3ee   :  { %v723_v12 = vmul.f32 %v718_v52, %v2506_v63  ;;  %v724_v61 = vmul.f32 %v717_v26, %v2511_v6  ;;  %v732_v63 = vpop.permute.xlu0 %731  ;;  %v735_v37 = vsel %vm278_vm5, %v726_v29, %v2818_v40 }
 0x3ef   :  { %v839_v54 = vsel %vm478_vm4, %v675_v16, %v795_v27  ;;  %v840_v24 = vsel %vm478_vm4, %v676_v28, %v796_v45  ;;  %v736_v5 = vsel %vm278_vm5, %v732_v63, %v726_v29 }
 0x3f0   :  { %v730_v43 = vpop.permute.xlu1 %729  ;;  %v807_v46 = vrot.slane %v723_v12, 4  ;;  %v808_v6 = vrot.slane %v724_v61, 4  ;;  %v740_v29 = vmul.f32 %v736_v5, %v2619_v55 }
 0x3f1   :  { %v734_v62 = vsel %vm278_vm5, %v2818_v40, %v730_v43  ;;  %v737_v40 = vmul.f32 %v735_v37, %v2599_v31  ;;  %v733_v32 = vsel %vm278_vm5, %v730_v43, %v732_v63 }
 0x3f2   :  { %v738_v3 = vmul.f32 %v734_v62, %v2556_v41  ;;  %v764_v56 = vpop.permute.xlu0 %763  ;;  %v739_v10 = vmul.f32 %v733_v32, %v2614_v49 }
 0x3f4   :  { %v762_v34 = vpop.permute.xlu1 %761  ;;  %v818_v41 = vrot.slane %v738_v3, 4 }
 0x3f5   :  { %v765_v4 = vsel %vm358_vm6, %v762_v34, %v764_v56 }
 0x3f6   :  { %v846_v12 = vsel %vm478_vm4, %v2752_v33, %v818_v41  ;;  %v774_v27 = vpop.permute.xlu0 %773  ;;  %v819_v33 = vrot.slane %v739_v10, 4 }
 0x3f8   :  { %v698_v19 = vpop.permute.xlu1 %697 }
 0x3f9   :  { %v701_v11 = vsel %vm198_vm3, %v698_v19, %v700_v2  ;;  %v702_v59 = vsel %vm198_vm3, %v696_v25, %v698_v19  ;;  %v766_v2 = vsel %vm358_vm6, %v2836_v53, %v762_v34  ;;  %v771_v34 = vmul.f32 %v765_v4, %v2623_v57 }
 0x3fa   :  { %v707_v18 = vmul.f32 %v702_v59, %v2541_v35  ;;  %v708_v39 = vmul.f32 %v701_v11, %v2545_v36  ;;  %v770_v60 = vmul.f32 %v766_v2, %v2561_v42  ;;  %v820_v19 = vrot.slane %v740_v29, 4 }
 0x3fc   :  { %v843_v25 = vsel %vm478_vm4, %v707_v18, %v807_v46  ;;  %v758_v23 = vpop.permute.xlu1 %757  ;;  %v844_v35 = vsel %vm478_vm4, %v708_v39, %v808_v6  ;;  %v830_v26 = vrot.slane %v770_v60, 4  ;;  %v778_v46 = vpop.permute.xlu0 %777  ;;  %v848_v39 = vsel %vm478_vm4, %v2758_v58, %v820_v19 }
 0x3fd   :  { %v856_v36 = vpack.c.bf16 %v844_v35, %v840_v24  ;;  %v855_v51 = vpack.c.bf16 %v843_v25, %v839_v54  ;;  %v767_v1 = vsel %vm358_vm6, %v758_v23, %v2836_v53  ;;  %v817_v53 = vrot.slane %v737_v40, 4 }
 0x3fe   :  { %v769_v31 = vmul.f32 %v767_v1, %v2586_v44  ;;  %v768_v38 = vsel %vm358_vm6, %v764_v56, %v758_v23 }
 0x3ff   :  { %921 = vmatprep.subr.bf16.mxu1 %v856_v36  ;;  %v772_v28 = vmul.f32 %v768_v38, %v2630_v21  ;;  %v845_v49 = vsel %vm478_vm4, %v2746_v50, %v817_v53  ;;  %v831_v21 = vrot.slane %v771_v34, 4  ;;  %v847_v50 = vsel %vm478_vm4, %v2776_v48, %v819_v33 }
 0x400   :  { %922 = vmatpush1.bf16.msra.mxu1 %v855_v51  ;;  %v746_v30 = vpop.permute.xlu1 %745  ;;  %v829_v45 = vrot.slane %v769_v31, 4 }
 0x401   :  { %v750_v42 = vsel %vm318_vm7, %v744_v14, %v746_v30  ;;  %v832_v59 = vrot.slane %v772_v28, 4 }
 0x402   :  { %v754_v52 = vmul.f32 %v750_v42, %v2603_v22 }
 0x404   :  { %v742_v43 = vpop.permute.xlu1 %741  ;;  %v850_v61 = vsel %vm478_vm4, %v754_v52, %v830_v26 }
 0x405   :  { %v751_v44 = vsel %vm318_vm7, %v742_v43, %v744_v14  ;;  %v858_v22 = vpack.c.bf16 %v850_v61, %v846_v12 }
 0x406   :  { %v753_v55 = vmul.f32 %v751_v44, %v2611_v17 }
 0x407   :  { %882 = vmatprep.subr.bf16.mxu0 %v858_v22 }
 0x408   :  { %v849_v16 = vsel %vm478_vm4, %v753_v55, %v829_v45  ;;  %v748_v62 = vpop.permute.xlu1 %747 }
 0x409   :  { %v749_v14 = vsel %vm318_vm7, %v746_v30, %v748_v62  ;;  %v752_v57 = vsel %vm318_vm7, %v748_v62, %v742_v43  ;;  %v857_v11 = vpack.c.bf16 %v849_v16, %v845_v49 }
 0x40a   :  { %v755_v17 = vmul.f32 %v749_v14, %v2649_v7  ;;  %v756_v63 = vmul.f32 %v752_v57, %v2652_v20 }
 0x40b   :  { %883 = vmatpush1.bf16.msra.mxu0 %v857_v11  ;;  %v2264_v11 = vmov 2  }
 0x40c   :  { %v851_v6 = vsel %vm478_vm4, %v755_v17, %v831_v21  ;;  %v776_v18 = vpop.permute.xlu1 %775  ;;  %v852_v37 = vsel %vm478_vm4, %v756_v63, %v832_v59  ;;  %2205 = vset.pattern.permute.xlu0 %v2264_v11  ;;  %v2265_v21 = vmov 3   ;;  %v3479_v59 = vmov 1  }
 0x40d   :  { %v782_v54 = vsel %vm398_vm8, %v776_v18, %v778_v46  ;;  %v783_v7 = vsel %vm398_vm8, %v774_v27, %v776_v18  ;;  %v860_v20 = vpack.c.bf16 %v852_v37, %v848_v39  ;;  %v859_v2 = vpack.c.bf16 %v851_v6, %v847_v50  ;;  %2206 = vset.pattern.permute.xlu1 %v2265_v21 }
 0x40e   :  { %v785_v3 = vmul.f32 %v783_v7, %v2657_v47  ;;  %v786_v48 = vmul.f32 %v782_v54, %v2680_v13  ;;  %v660_v13 = vld [vmem:[%s3452_s4] sm:$0x3] }
 0x40f   :  { %923 = vmatprep.subr.bf16.mxu1 %v860_v20 }
 0x410   :  { %v861_v25 = vpack.c.bf16 %v785_v3, %v785_v3  ;;  %v862_v23 = vpack.c.bf16 %v786_v48, %v786_v48  ;;  %924 = vmatpush1.bf16.msra.mxu1 %v859_v2  ;;  %v780_v24 = vpop.permute.xlu1 %779 }
 0x411   :  { %v781_v58 = vsel %vm398_vm8, %v778_v46, %v780_v24  ;;  %v784_v35 = vsel %vm398_vm8, %v780_v24, %v774_v27 }
 0x412   :  { %v787_v36 = vmul.f32 %v781_v58, %v2683_v0  ;;  %v788_v51 = vmul.f32 %v784_v35, %v2673_v15  ;;  %2054 = vmatprep.subr.msk.bf16.mxu0 %vm512_vm9, %v862_v23  ;;  %v869_v47 = vsel %vm512_vm9, %v861_v25, 0  ;;  %v3478_v0 = vmov 0  }
 0x413   :  { %885 = vmatpush1.bf16.msra.mxu0 %v869_v47 }
 0x414   :  { %v863_v60 = vpack.c.bf16 %v787_v36, %v787_v36  ;;  %v864_v40 = vpack.c.bf16 %v788_v51, %v788_v51 }
 0x416   :  { %2055 = vmatmul.mubr.msk.bf16.vlgmr.msra.gmra.mrb[4].mxu0 %vm508_vm11, %v660_v13  ;;  %2056 = vmatprep.subr.msk.bf16.mxu1 %vm512_vm9, %v864_v40  ;;  %v875_v1 = vsel %vm512_vm9, %v863_v60, 0 }
 0x417   :  { %926 = vmatpush1.bf16.msra.mxu1 %v875_v1  ;;  %1452 = vmatprep.mubr.bf16.mxu0 %v3478_v0 }
 0x41a   :  { %2057 = vmatmul.mubr.msk.bf16.vlgmr.msra.gmra.mrb[4].mxu1 %vm508_vm11, %v660_v13 }
 0x41b   :  { %1493 = vmatprep.mubr.bf16.mxu1 %v3478_v0 }
 0x4e9   :  { %v914_v15 = vpop.f32.mrb[4].mxu0 }
 0x4ea   :  { %v962_v56 = vsel %vm478_vm4, %v914_v15, 0.0  ;;  %v916_v41 = vpop.f32.mrb[5].mxu0 }
 0x4eb   :  { %v963_v30 = vsel %vm478_vm4, %v916_v41, 0.0  ;;  %v918_v5 = vpop.f32.mrb[6].mxu0 }
 0x4ec   :  { %v964_v32 = vadd.f32 %v963_v30, %v962_v56  ;;  %v919_v42 = vpop.f32.mrb[7].mxu0  ;;  %v2058_v5 = vld [vmem:[%s3449_s1 + $0x1] ss:$8 sm:$0xf] }
 0x4ed   :  { %v955_v26 = vpop.f32.mrb[4].mxu1 }
 0x4ee   :  { %v965_v31 = vsel %vm478_vm4, %v955_v26, 0.0  ;;  %v957_v52 = vpop.f32.mrb[5].mxu1 }
 0x4ef   :  { %v966_v53 = vadd.f32 %v965_v31, %v964_v32  ;;  %v967_v4 = vsel %vm478_vm4, %v957_v52, 0.0  ;;  %v959_v38 = vpop.f32.mrb[6].mxu1  ;;  %v3480_v31 = vld [vmem:[#allocation2_spill] sm:$0xff] }
 0x4f0   :  { %v960_v29 = vpop.f32.mrb[7].mxu1  ;;  %v1037_v38 = vld [vmem:[%s3449_s1] ss:$8 sm:$0xf] }
 0x4f1   :  { %v968_v10 = vadd.f32 %v967_v4, %v966_v53  ;;  %v3481_v53 = vld [vmem:[#allocation3_spill] sm:$0xff] }
 0x4f2   :  { %v1080_v4 = vrot.slane %v2058_v5, %v3481_v53 }
 0x4f3   :  { %969 = vadd.xlane.f32.xlu0 %v968_v10 }
 0x580   :  { %v970_v43 = vpop.xlane.xlu0 %969 }
 0x581   :  { %v971_v12 = vmul.f32 0.001953125, %v970_v43 }
 0x583   :  { %v972_v61 = vsub.f32 %v914_v15, %v971_v12  ;;  %v973_v44 = vsub.f32 %v916_v41, %v971_v12  ;;  %v974_v22 = vsub.f32 %v955_v26, %v971_v12  ;;  %v975_v27 = vsub.f32 %v957_v52, %v971_v12  ;;  %v2060_v26 = vld [vmem:[%s3449_s1 + $0x3] ss:$8 sm:$0xf] }
 0x584   :  { %v1084_v52 = vrot.slane %v2058_v5, %v3480_v31  ;;  %v1156_v43 = vrot.slane %v2060_v26, %v3481_v53  ;;  %v1160_v12 = vrot.slane %v2060_v26, %v3480_v31 }
 0x585   :  { %v976_v34 = vmul.f32 %v972_v61, %v972_v61  ;;  %v977_v28 = vmul.f32 %v973_v44, %v973_v44  ;;  %v978_v45 = vmul.f32 %v974_v22, %v974_v22  ;;  %v979_v55 = vmul.f32 %v975_v27, %v975_v27 }
 0x587   :  { %v980_v49 = vsel %vm478_vm4, %v976_v34, 0.0  ;;  %v981_v19 = vsel %vm478_vm4, %v977_v28, 0.0  ;;  %v983_v16 = vsel %vm478_vm4, %v978_v45, 0.0  ;;  %v985_v14 = vsel %vm478_vm4, %v979_v55, 0.0  ;;  %v3483_v34 = vld [vmem:[#allocation5_spill] sm:$0xff] }
 0x588   :  { %v982_v33 = vadd.f32 %v981_v19, %v980_v49  ;;  %v1092_v28 = vrot.slane %v2058_v5, %v3483_v34  ;;  %v1168_v19 = vrot.slane %v2060_v26, %v3483_v34 }
 0x58a   :  { %v984_v62 = vadd.f32 %v983_v16, %v982_v33  ;;  %v1042_v33 = vrot.slane %v1037_v38, %v3481_v53  ;;  %v1046_v16 = vrot.slane %v1037_v38, %v3480_v31 }
 0x58c   :  { %v986_v57 = vadd.f32 %v985_v14, %v984_v62  ;;  %v2059_v62 = vld [vmem:[%s3449_s1 + $0x2] ss:$8 sm:$0xf] }
 0x58e   :  { %987 = vadd.xlane.f32.xlu1 %v986_v57 }
 0x59f   :  { %1003 = vperm.xlu1 %2206, %v2741_v8  }
 0x5a3   :  { %2208 = vset.pattern.permute.xlu1 %v3479_v59 }
 0x61b   :  { %v988_v17 = vpop.xlane.xlu1 %987 }
 0x61c   :  { %v989_v63 = vmul.f32 0.001953125, %v988_v17 }
 0x61e   :  { %v990_v50 = vadd.f32 1e-05, %v989_v63 }
 0x61f   :  { %v1004_v39 = vpop.permute.xlu1 %1003 }
 0x620   :  { %2248 = vrsqrt.f32 %v990_v50 }
 0x62a   :  { %v2249_v46 = vpop.eup %2248 }
 0x62b   :  { %v992_v6 = vmul.f32 %v2249_v46, %v2741_v8 }
 0x62d   :  { %995 = vperm.xlu0 %2205, %v992_v6  }
 0x631   :  { %2207 = vset.pattern.permute.xlu0 %v3478_v0 }
 0x6ac   :  { %v996_v18 = vpop.permute.xlu0 %995 }
 0x6ad   :  { %v998_v37 = vmul.f32 %v996_v18, %v972_v61  ;;  %v999_v54 = vmul.f32 %v996_v18, %v973_v44  ;;  %v1000_v7 = vmul.f32 %v996_v18, %v974_v22  ;;  %v1001_v20 = vmul.f32 %v996_v18, %v975_v27  ;;  %v3482_v22 = vld [vmem:[#allocation4_spill] sm:$0xff] }
 0x6ae   :  { %v1088_v27 = vrot.slane %v2058_v5, %v3482_v22  ;;  %v1164_v49 = vrot.slane %v2060_v26, %v3482_v22 }
 0x6af   :  { %v1006_v2 = vadd.f32 %v1004_v39, %v998_v37  ;;  %v1007_v3 = vadd.f32 %v1004_v39, %v999_v54  ;;  %v1008_v48 = vadd.f32 %v1004_v39, %v1000_v7  ;;  %v1009_v25 = vadd.f32 %v1004_v39, %v1001_v20 }
 0x6b0   :  { %v1050_v37 = vrot.slane %v1037_v38, %v3482_v22  ;;  %v1054_v54 = vrot.slane %v1037_v38, %v3483_v34  ;;  %v1118_v7 = vrot.slane %v2059_v62, %v3481_v53  ;;  %v1122_v20 = vrot.slane %v2059_v62, %v3480_v31 }
 0x6b1   :  { %v2967_v23 = vmax.f32 %v1006_v2, 0.0  ;;  %v2969_v24 = vmax.f32 %v1007_v3, 0.0  ;;  %v2971_v58 = vmax.f32 %v1008_v48, 0.0  ;;  %v2973_v8 = vmax.f32 %v1009_v25, 0.0 }
 0x6b2   :  { %v1126_v48 = vrot.slane %v2059_v62, %v3482_v22  ;;  %v1130_v25 = vrot.slane %v2059_v62, %v3483_v34 }
 0x6b3   :  { %v1018_v35 = vcombine.low %v2967_v23, %v2969_v24  ;;  %v1019_v36 = vcombine.low %v2971_v58, %v2973_v8  ;;  %1141 = vrot.lane.b32.xlu0 %v2969_v24, %s2254_s15  ;;  %1063 = vrot.lane.b32.xlu1 %v2967_v23, %s2255_s16 }
 0x6b5   :  { %1022 = vst [vmem:[%s3453_s10] sm:$0xff] %v1018_v35  ;;  %1023 = vst [vmem:[%s3453_s10 + $0x8] sm:$0xff] %v1019_v36 }
 0x6b7   :  { %1145 = vrot.lane.b32.xlu0 %v2973_v8, %s2254_s15  ;;  %1065 = vrot.lane.b32.xlu1 %v2969_v24, %s2255_s16 }
 0x6bb   :  { %1027 = vrot.lane.b32.xlu0 %v2969_v24, %s2256_s19  ;;  %1067 = vrot.lane.b32.xlu1 %v2971_v58, %s2255_s16 }
 0x6bf   :  { %1031 = vrot.lane.b32.xlu0 %v2973_v8, %s2256_s19  ;;  %1069 = vrot.lane.b32.xlu1 %v2973_v8, %s2255_s16 }
 0x6c3   :  { %1103 = vrot.lane.b32.xlu0 %v2969_v24, %s2257_s0  ;;  %1139 = vrot.lane.b32.xlu1 %v2967_v23, %s2254_s15 }
 0x6c7   :  { %1107 = vrot.lane.b32.xlu0 %v2973_v8, %s2257_s0  ;;  %1143 = vrot.lane.b32.xlu1 %v2971_v58, %s2254_s15 }
 0x6cb   :  { %1179 = vrot.lane.b32.xlu0 %v2969_v24, %s2258_s20  ;;  %1025 = vrot.lane.b32.xlu1 %v2967_v23, %s2256_s19 }
 0x6cf   :  { %1183 = vrot.lane.b32.xlu0 %v2973_v8, %s2258_s20  ;;  %1029 = vrot.lane.b32.xlu1 %v2971_v58, %s2256_s19 }
 0x6d3   :  { %1255 = vrot.lane.b32.xlu0 %v2969_v24, %s2259_s21  ;;  %1101 = vrot.lane.b32.xlu1 %v2967_v23, %s2257_s0 }
 0x6d7   :  { %1259 = vrot.lane.b32.xlu0 %v2973_v8, %s2259_s21  ;;  %1105 = vrot.lane.b32.xlu1 %v2971_v58, %s2257_s0 }
 0x6db   :  { %1217 = vrot.lane.b32.xlu0 %v2969_v24, %s2260_s22  ;;  %1177 = vrot.lane.b32.xlu1 %v2967_v23, %s2258_s20 }
 0x6df   :  { %1221 = vrot.lane.b32.xlu0 %v2973_v8, %s2260_s22  ;;  %1181 = vrot.lane.b32.xlu1 %v2971_v58, %s2258_s20 }
 0x6e3   :  { %1293 = vrot.lane.b32.xlu0 %v2969_v24, %s2262_s23  ;;  %1253 = vrot.lane.b32.xlu1 %v2967_v23, %s2259_s21 }
 0x6e7   :  { %1297 = vrot.lane.b32.xlu0 %v2973_v8, %s2262_s23  ;;  %1257 = vrot.lane.b32.xlu1 %v2971_v58, %s2259_s21 }
 0x6eb   :  { %1215 = vrot.lane.b32.xlu1 %v2967_v23, %s2260_s22 }
 0x6ef   :  { %1219 = vrot.lane.b32.xlu1 %v2971_v58, %s2260_s22 }
 0x6f3   :  { %1291 = vrot.lane.b32.xlu1 %v2967_v23, %s2262_s23 }
 0x6f7   :  { %1295 = vrot.lane.b32.xlu1 %v2971_v58, %s2262_s23 }
 0x725   :  { %v1142_v51 = vpop.permute.xlu0 %1141  ;;  %v1064_v47 = vpop.permute.xlu1 %1063 }
 0x729   :  { %v1146_v13 = vpop.permute.xlu0 %1145  ;;  %v1066_v60 = vpop.permute.xlu1 %1065 }
 0x72a   :  { %v1073_v29 = vsel %vm158_vm1, %v1064_v47, %v1066_v60 }
 0x72b   :  { %v1098_v14 = vmul.f32 %v1084_v52, %v1073_v29 }
 0x72d   :  { %v1028_v40 = vpop.permute.xlu0 %1027  ;;  %v1068_v1 = vpop.permute.xlu1 %1067 }
 0x72e   :  { %v1072_v57 = vsel %vm158_vm1, %v1066_v60, %v1068_v1 }
 0x72f   :  { %v1099_v2 = vmul.f32 %v1088_v27, %v1072_v57 }
 0x731   :  { %v1032_v15 = vpop.permute.xlu0 %1031  ;;  %v1070_v56 = vpop.permute.xlu1 %1069 }
 0x732   :  { %v1074_v10 = vsel %vm158_vm1, %v1070_v56, %v1064_v47  ;;  %v1071_v59 = vsel %vm158_vm1, %v1068_v1, %v1070_v56  ;;  %v1334_v1 = vrot.slane %v1098_v14, 4 }
 0x733   :  { %v1097_v17 = vmul.f32 %v1080_v4, %v1074_v10  ;;  %v1100_v3 = vmul.f32 %v1092_v28, %v1071_v59 }
 0x735   :  { %v3049_v41 = vpop.permute.xlu0 %1103  ;;  %v1140_v30 = vpop.permute.xlu1 %1139  ;;  %v1333_v56 = vrot.slane %v1097_v17, 4 }
 0x736   :  { %v1149_v45 = vsel %vm238_vm0, %v1140_v30, %v1142_v51  ;;  %v1150_v55 = vsel %vm238_vm0, %v1146_v13, %v1140_v30 }
 0x737   :  { %v1173_v63 = vmul.f32 %v1156_v43, %v1150_v55  ;;  %v1174_v50 = vmul.f32 %v1160_v12, %v1149_v45  ;;  %v1335_v12 = vrot.slane %v1099_v2, 4  ;;  %v2063_v2 = vld [vmem:[%s3449_s1 + $0x7] ss:$8 sm:$0xf] }
 0x739   :  { %v3054_v32 = vpop.permute.xlu0 %1107  ;;  %v1144_v42 = vpop.permute.xlu1 %1143  ;;  %v1345_v30 = vrot.slane %v1173_v63, 4  ;;  %v1346_v5 = vrot.slane %v1174_v50, 4 }
 0x73a   :  { %v1147_v35 = vsel %vm238_vm0, %v1144_v42, %v1146_v13  ;;  %v1148_v36 = vsel %vm238_vm0, %v1142_v51, %v1144_v42 }
 0x73b   :  { %v1175_v42 = vmul.f32 %v1164_v49, %v1148_v36  ;;  %v1176_v38 = vmul.f32 %v1168_v19, %v1147_v35  ;;  %v1282_v35 = vrot.slane %v2063_v2, %v3483_v34 }
 0x73d   :  { %v3070_v61 = vpop.permute.xlu0 %1179  ;;  %v1026_v44 = vpop.permute.xlu1 %1025  ;;  %v1347_v14 = vrot.slane %v1175_v42, 4  ;;  %v1348_v57 = vrot.slane %v1176_v38, 4  ;;  %v1274_v42 = vrot.slane %v2063_v2, %v3480_v31 }
 0x73e   :  { %v1035_v46 = vsel %vm119_vm2, %v1026_v44, %v1028_v40  ;;  %v1036_v6 = vsel %vm119_vm2, %v1032_v15, %v1026_v44  ;;  %v1336_v44 = vrot.slane %v1100_v3, 4 }
 0x73f   :  { %v1059_v47 = vmul.f32 %v1042_v33, %v1036_v6  ;;  %v1060_v60 = vmul.f32 %v1046_v16, %v1035_v46 }
 0x741   :  { %v3093_v18 = vpop.permute.xlu0 %1183  ;;  %v1030_v39 = vpop.permute.xlu1 %1029  ;;  %v1378_v27 = vsel %vm478_vm4, %v1060_v60, %v1334_v1  ;;  %v2062_v60 = vld [vmem:[%s3449_s1 + $0x6] ss:$8 sm:$0xf] }
 0x742   :  { %v1033_v52 = vsel %vm119_vm2, %v1030_v39, %v1032_v15  ;;  %v1034_v4 = vsel %vm119_vm2, %v1028_v40, %v1030_v39  ;;  %v1377_v15 = vsel %vm478_vm4, %v1059_v47, %v1333_v56 }
 0x743   :  { %v1061_v40 = vmul.f32 %v1050_v37, %v1034_v4  ;;  %v1062_v28 = vmul.f32 %v1054_v54, %v1033_v52 }
 0x745   :  { %v1102_v26 = vpop.permute.xlu1 %1101  ;;  %v1256_v29 = vpop.permute.xlu0 %1255  ;;  %v1379_v63 = vsel %vm478_vm4, %v1061_v40, %v1335_v12  ;;  %v1244_v12 = vrot.slane %v2062_v60, %v3483_v34 }
 0x746   :  { %v1111_v13 = vsel %vm198_vm3, %v1102_v26, %v3049_v41  ;;  %v1112_v51 = vsel %vm198_vm3, %v3054_v32, %v1102_v26 }
 0x747   :  { %v1135_v10 = vmul.f32 %v1118_v7, %v1112_v51  ;;  %v1136_v43 = vmul.f32 %v1122_v20, %v1111_v13  ;;  %v2061_v7 = vld [vmem:[%s3449_s1 + $0x5] ss:$8 sm:$0xf]  ;;  %v1270_v51 = vrot.slane %v2063_v2, %v3481_v53 }
 0x748   :  { %v1206_v3 = vrot.slane %v2061_v7, %v3483_v34  ;;  %v1194_v36 = vrot.slane %v2061_v7, %v3481_v53  ;;  %v1202_v26 = vrot.slane %v2061_v7, %v3482_v22 }
 0x749   :  { %v1381_v45 = vsel %vm478_vm4, %v1135_v10, %v1345_v30  ;;  %v1106_v55 = vpop.permute.xlu1 %1105  ;;  %v1382_v33 = vsel %vm478_vm4, %v1136_v43, %v1346_v5  ;;  %v1260_v50 = vpop.permute.xlu0 %1259  ;;  %v1198_v5 = vrot.slane %v2061_v7, %v3480_v31  ;;  %v1278_v43 = vrot.slane %v2063_v2, %v3482_v22 }
 0x74a   :  { %v1109_v49 = vsel %vm198_vm3, %v1106_v55, %v3054_v32  ;;  %v1110_v19 = vsel %vm198_vm3, %v3049_v41, %v1106_v55  ;;  %v1394_v16 = vpack.c.bf16 %v1382_v33, %v1378_v27  ;;  %v1393_v62 = vpack.c.bf16 %v1381_v45, %v1377_v15  ;;  %v2064_v33 = vld [vmem:[%s3449_s1 + $0x20] ss:$8 sm:$0xf] }
 0x74b   :  { %v1137_v59 = vmul.f32 %v1126_v48, %v1110_v19  ;;  %v1138_v17 = vmul.f32 %v1130_v25, %v1109_v49  ;;  %v1380_v32 = vsel %vm478_vm4, %v1062_v28, %v1336_v44  ;;  %v1236_v55 = vrot.slane %v2062_v60, %v3480_v31 }
 0x74c   :  { %1420 = vmatprep.subr.bf16.mxu0 %v1394_v16 }
 0x74d   :  { %v1383_v46 = vsel %vm478_vm4, %v1137_v59, %v1347_v14  ;;  %1421 = vmatpush1.bf16.msra.mxu0 %v1393_v62  ;;  %v1178_v6 = vpop.permute.xlu1 %1177  ;;  %v1384_v39 = vsel %vm478_vm4, %v1138_v17, %v1348_v57  ;;  %v1218_v20 = vpop.permute.xlu0 %1217 }
 0x74e   :  { %v1396_v37 = vpack.c.bf16 %v1384_v39, %v1380_v32  ;;  %v1395_v41 = vpack.c.bf16 %v1383_v46, %v1379_v63  ;;  %v1188_v25 = vsel %vm278_vm5, %v3093_v18, %v1178_v6  ;;  %v1187_v1 = vsel %vm278_vm5, %v1178_v6, %v3070_v61 }
 0x74f   :  { %v1214_v56 = vmul.f32 %v1206_v3, %v1188_v25  ;;  %v1211_v44 = vmul.f32 %v1194_v36, %v1187_v1  ;;  %v1308_v46 = vrot.slane %v2064_v33, %v3481_v53  ;;  %v1320_v6 = vrot.slane %v2064_v33, %v3483_v34 }
 0x750   :  { %1461 = vmatprep.subr.bf16.mxu1 %v1396_v37 }
 0x751   :  { %1462 = vmatpush1.bf16.msra.mxu1 %v1395_v41  ;;  %v1182_v54 = vpop.permute.xlu1 %1181  ;;  %v1222_v30 = vpop.permute.xlu0 %1221  ;;  %v1360_v27 = vrot.slane %v1214_v56, 4  ;;  %v1357_v63 = vrot.slane %v1211_v44, 4 }
 0x752   :  { %v1185_v4 = vsel %vm278_vm5, %v1182_v54, %v3093_v18  ;;  %v1186_v13 = vsel %vm278_vm5, %v3070_v61, %v1182_v54  ;;  %v1232_v61 = vrot.slane %v2062_v60, %v3481_v53 }
 0x753   :  { %v1212_v40 = vmul.f32 %v1198_v5, %v1186_v13  ;;  %v1213_v28 = vmul.f32 %v1202_v26, %v1185_v4  ;;  %v1388_v41 = vsel %vm478_vm4, %v2973_v8, %v1360_v27  ;;  %v1385_v36 = vsel %vm478_vm4, %v2967_v23, %v1357_v63  ;;  %v3304_v63 = vld [vmem:[%s3454_s2 + $0x98] sm:$0xff]  }
 0x754   :  { %v1312_v8 = vrot.slane %v2064_v33, %v3480_v31 }
 0x755   :  { %v1254_v48 = vpop.permute.xlu1 %1253  ;;  %v1294_v62 = vpop.permute.xlu0 %1293  ;;  %v1358_v32 = vrot.slane %v1212_v40, 4  ;;  %v1359_v39 = vrot.slane %v1213_v28, 4  ;;  %v1024_v40 = vld [vmem:[%s3455_s5] sm:$0xf] }
 0x756   :  { %v1264_v47 = vsel %vm358_vm6, %v1260_v50, %v1254_v48  ;;  %v1263_v38 = vsel %vm358_vm6, %v1254_v48, %v1256_v29  ;;  %v3225_v28 = vld [vmem:[%s3454_s2] sm:$0xff]  }
 0x757   :  { %v1290_v10 = vmul.f32 %v1282_v35, %v1264_v47  ;;  %v1287_v49 = vmul.f32 %v1270_v51, %v1263_v38  ;;  %v1316_v51 = vrot.slane %v2064_v33, %v3482_v22  ;;  %v3242_v33 = vld [vmem:[%s3454_s2 + $0xc8] sm:$0xff]  }
 0x759   :  { %v1258_v52 = vpop.permute.xlu1 %1257  ;;  %v1372_v14 = vrot.slane %v1290_v10, 4  ;;  %v1369_v7 = vrot.slane %v1287_v49, 4  ;;  %v1298_v1 = vpop.permute.xlu0 %1297  ;;  %v3251_v49 = vld [vmem:[%s3454_s2 + $0x8] sm:$0xff]  }
 0x75a   :  { %v1261_v18 = vsel %vm358_vm6, %v1258_v52, %v1260_v50  ;;  %v1262_v15 = vsel %vm358_vm6, %v1256_v29, %v1258_v52  ;;  %v1240_v29 = vrot.slane %v2062_v60, %v3482_v22  ;;  %v1387_v60 = vsel %vm478_vm4, %v2971_v58, %v1359_v39  ;;  %v3209_v22 = vld [vmem:[%s3454_s2 + $0x40] sm:$0xff]   ;;  %v3335_v39 = vld [vmem:[%s3454_s2 + $0x68] sm:$0xff]  }
 0x75b   :  { %v1288_v57 = vmul.f32 %v1274_v42, %v1262_v15  ;;  %v1289_v59 = vmul.f32 %v1278_v43, %v1261_v18 }
 0x75d   :  { %v1216_v45 = vpop.permute.xlu1 %1215  ;;  %v1370_v25 = vrot.slane %v1288_v57, 4  ;;  %v1371_v53 = vrot.slane %v1289_v59, 4  ;;  %v3287_v57 = vld [vmem:[%s3454_s2 + $0x58] sm:$0xff]  }
 0x75e   :  { %v1225_v19 = vsel %vm318_vm7, %v1216_v45, %v1218_v20  ;;  %v1226_v16 = vsel %vm318_vm7, %v1222_v30, %v1216_v45  ;;  %v3230_v45 = vld [vmem:[%s3454_s2 + $0x80] sm:$0xff]   ;;  %v3292_v59 = vld [vmem:[%s3454_s2 + $0xd8] sm:$0xff]  }
 0x75f   :  { %v1252_v17 = vmul.f32 %v1244_v12, %v1226_v16  ;;  %v1249_v50 = vmul.f32 %v1232_v61, %v1225_v19  ;;  %v3214_v61 = vld [vmem:[%s3454_s2 + $0xc0] sm:$0xff]   ;;  %v3256_v19 = vld [vmem:[%s3454_s2 + $0x88] sm:$0xff]   ;;  %v3263_v16 = vld [vmem:[%s3454_s2 + $0x50] sm:$0xff]  }
 0x761   :  { %v1220_v37 = vpop.permute.xlu1 %1219  ;;  %v1392_v54 = vsel %vm478_vm4, %v1252_v17, %v1372_v14  ;;  %v1389_v47 = vsel %vm478_vm4, %v1249_v50, %v1369_v7  ;;  %v3280_v14 = vld [vmem:[%s3454_s2 + $0x90] sm:$0xff]   ;;  %v3299_v17 = vld [vmem:[%s3454_s2 + $0x18] sm:$0xff]   ;;  %v3311_v50 = vld [vmem:[%s3454_s2 + $0x60] sm:$0xff]  }
 0x762   :  { %v1223_v2 = vsel %vm318_vm7, %v1220_v37, %v1222_v30  ;;  %v1224_v3 = vsel %vm318_vm7, %v1218_v20, %v1220_v37  ;;  %v1400_v48 = vpack.c.bf16 %v1392_v54, %v1388_v41  ;;  %v1386_v30 = vsel %vm478_vm4, %v2969_v24, %v1358_v32  ;;  %v3328_v32 = vld [vmem:[%s3454_s2 + $0xa0] sm:$0xff]   ;;  %v3340_v37 = vld [vmem:[%s3454_s2 + $0xe8] sm:$0xff]   ;;  %v3359_v7 = vld [vmem:[%s3454_s2 + $0x70] sm:$0xff]  }
 0x763   :  { %v1250_v35 = vmul.f32 %v1236_v55, %v1224_v3  ;;  %v1251_v34 = vmul.f32 %v1240_v29, %v1223_v2  ;;  %v1397_v58 = vpack.c.bf16 %v1389_v47, %v1385_v36  ;;  %v3237_v55 = vld [vmem:[%s3454_s2 + $0x48] sm:$0xff]   ;;  %v3268_v29 = vld [vmem:[%s3454_s2 + $0xd0] sm:$0xff]  }
 0x764   :  { %1463 = vmatprep.subr.bf16.mxu1 %v1400_v48  ;;  %v3347_v41 = vld [vmem:[%s3454_s2 + $0x28] sm:$0xff]   ;;  %v3364_v2 = vld [vmem:[%s3454_s2 + $0xf0] sm:$0xff]  }
 0x765   :  { %v1391_v56 = vsel %vm478_vm4, %v1251_v34, %v1371_v53  ;;  %v1292_v20 = vpop.permute.xlu1 %1291  ;;  %v1390_v5 = vsel %vm478_vm4, %v1250_v35, %v1370_v25  ;;  %v3352_v54 = vld [vmem:[%s3454_s2 + $0xa8] sm:$0xff]   ;;  %v3371_v3 = vld [vmem:[%s3454_s2 + $0x30] sm:$0xff]   ;;  %v3383_v25 = vld [vmem:[%s3454_s2 + $0x78] sm:$0xff]  }
 0x766   :  { %v1301_v23 = vsel %vm398_vm8, %v1292_v20, %v1294_v62  ;;  %v1302_v26 = vsel %vm398_vm8, %v1298_v1, %v1292_v20  ;;  %v1398_v52 = vpack.c.bf16 %v1390_v5, %v1386_v30  ;;  %v1399_v31 = vpack.c.bf16 %v1391_v56, %v1387_v60  ;;  %v3376_v48 = vld [vmem:[%s3454_s2 + $0xb0] sm:$0xff]   ;;  %v3388_v53 = vld [vmem:[%s3454_s2 + $0xf8] sm:$0xff]   ;;  %v3484_v36 = vld [vmem:[#allocation7_spill] sm:$0xff] }
 0x767   :  { %v1325_v4 = vmul.f32 %v1308_v46, %v1301_v23  ;;  %v1328_v13 = vmul.f32 %v1320_v6, %v1302_v26  ;;  %v3316_v46 = vld [vmem:[%s3454_s2 + $0xe0] sm:$0xff]   ;;  %v2244_v35 = vld [vmem:[%s3454_s2 + $0x38] sm:$0xff]   ;;  %v3485_v47 = vld [vmem:[#allocation8_spill] sm:$0xff] }
 0x768   :  { %1422 = vmatprep.subr.bf16.mxu0 %v1398_v52  ;;  %1464 = vmatpush1.bf16.msra.mxu1 %v1399_v31  ;;  %v3323_v6 = vld [vmem:[%s3454_s2 + $0x20] sm:$0xff]   ;;  %v2245_v34 = vld [vmem:[%s3454_s2 + $0xb8] sm:$0xff]  }
 0x769   :  { %v1404_v42 = vpack.c.bf16 %v1328_v13, %v1328_v13  ;;  %1423 = vmatpush1.bf16.msra.mxu0 %v1397_v58  ;;  %v1296_v24 = vpop.permute.xlu1 %1295  ;;  %v1401_v43 = vpack.c.bf16 %v1325_v4, %v1325_v4  ;;  %v3486_v13 = vld [vmem:[#allocation6_spill] sm:$0xff]  ;;  %v3487_v58 = vld [vmem:[#allocation9_spill] sm:$0xff] }
 0x76a   :  { %v1299_v38 = vsel %vm398_vm8, %v1296_v24, %v1298_v1  ;;  %v1300_v10 = vsel %vm398_vm8, %v1294_v62, %v1296_v24  ;;  %v3275_v62 = vld [vmem:[%s3454_s2 + $0x10] sm:$0xff]  }
 0x76b   :  { %v1326_v12 = vmul.f32 %v1312_v8, %v1300_v10  ;;  %v1327_v44 = vmul.f32 %v1316_v51, %v1299_v38  ;;  %2067 = vmatprep.subr.msk.bf16.mxu1 %vm512_vm9, %v1404_v42  ;;  %v1409_v9 = vsel %vm512_vm9, %v1401_v43, 0  ;;  %v1839_v51 = vld [vmem:[%s3456_s6] sm:$0xf] }
 0x76d   :  { %v1402_v18 = vpack.c.bf16 %v1326_v12, %v1326_v12  ;;  %v1403_v15 = vpack.c.bf16 %v1327_v44, %v1327_v44 }
 0x76f   :  { %2065 = vmatprep.subr.msk.bf16.mxu0 %vm512_vm9, %v1402_v18  ;;  %v1415_v27 = vsel %vm512_vm9, %v1403_v15, 0 }
 0x770   :  { %1425 = vmatpush1.bf16.msra.mxu0 %v1409_v9  ;;  %1466 = vmatpush1.bf16.msra.mxu1 %v1415_v27 }
 0x771   :  { %2103 = vmatprep.subr.bf16.mxu0 %v3209_v22  ;;  %2125 = vmatprep.subr.bf16.mxu1 %v3214_v61 }
 0x773   :  { %2066 = vmatmul.mubr.msk.bf16.vlgmr.msra.gmra.mrb[8].mxu0 %vm508_vm11, %v1024_v40  ;;  %2068 = vmatmul.mubr.msk.bf16.vlgmr.msra.gmra.mrb[8].mxu1 %vm508_vm11, %v1024_v40 }
 0x774   :  { %2104 = vmatpush3.bf16.msra.mxu0 %v3225_v28  ;;  %2126 = vmatpush3.bf16.msra.mxu1 %v3230_v45 }
 0x775   :  { %2105 = vmatprep.subr.bf16.mxu0 %v3237_v55  ;;  %2127 = vmatprep.subr.bf16.mxu1 %v3242_v33 }
 0x778   :  { %2106 = vmatpush3.bf16.msra.mxu0 %v3251_v49  ;;  %2128 = vmatpush3.bf16.msra.mxu1 %v3256_v19 }
 0x779   :  { %2107 = vmatprep.subr.bf16.mxu0 %v3263_v16  ;;  %2129 = vmatprep.subr.bf16.mxu1 %v3268_v29 }
 0x77c   :  { %2108 = vmatpush3.bf16.msra.mxu0 %v3275_v62  ;;  %2130 = vmatpush3.bf16.msra.mxu1 %v3280_v14 }
 0x77d   :  { %2109 = vmatprep.subr.bf16.mxu0 %v3287_v57  ;;  %2131 = vmatprep.subr.bf16.mxu1 %v3292_v59 }
 0x780   :  { %2110 = vmatpush3.bf16.msra.mxu0 %v3299_v17  ;;  %2132 = vmatpush3.bf16.msra.mxu1 %v3304_v63 }
 0x781   :  { %2111 = vmatprep.subr.bf16.mxu0 %v3311_v50  ;;  %2133 = vmatprep.subr.bf16.mxu1 %v3316_v46 }
 0x784   :  { %2112 = vmatpush3.bf16.msra.mxu0 %v3323_v6  ;;  %2134 = vmatpush3.bf16.msra.mxu1 %v3328_v32 }
 0x785   :  { %2113 = vmatprep.subr.bf16.mxu0 %v3335_v39  ;;  %2135 = vmatprep.subr.bf16.mxu1 %v3340_v37 }
 0x788   :  { %2114 = vmatpush3.bf16.msra.mxu0 %v3347_v41  ;;  %2136 = vmatpush3.bf16.msra.mxu1 %v3352_v54 }
 0x789   :  { %2115 = vmatprep.subr.bf16.mxu0 %v3359_v7  ;;  %2137 = vmatprep.subr.bf16.mxu1 %v3364_v2 }
 0x78c   :  { %2116 = vmatpush3.bf16.msra.mxu0 %v3371_v3  ;;  %2138 = vmatpush3.bf16.msra.mxu1 %v3376_v48 }
 0x78d   :  { %2117 = vmatprep.subr.bf16.mxu0 %v3383_v25  ;;  %2139 = vmatprep.subr.bf16.mxu1 %v3388_v53 }
 0x790   :  { %2118 = vmatpush3.bf16.msra.mxu0 %v2244_v35  ;;  %2140 = vmatpush3.bf16.msra.mxu1 %v2245_v34 }
 0x791   :  { %1844 = vmatprep.subr.bf16.mxu0 %v3484_v36  ;;  %1885 = vmatprep.subr.bf16.mxu1 %v3485_v47  ;;  %v100_v36 = vld [vmem:[%s3457_s8] sm:$0xff] }
 0x846   :  { %v1454_v8 = vpop.f32.mrb[8].mxu0  ;;  %v1495_v60 = vpop.f32.mrb[8].mxu1 }
 0x847   :  { %v1456_v1 = vpop.f32.mrb[9].mxu0  ;;  %v1497_v56 = vpop.f32.mrb[9].mxu1  ;;  %v1502_v26 = vpack.c.bf16 %v1454_v8, %v1454_v8  ;;  %v1504_v52 = vpack.c.bf16 %v1495_v60, %v1495_v60 }
 0x848   :  { %v1503_v20 = vpack.c.bf16 %v1456_v1, %v1456_v1  ;;  %v1505_v30 = vpack.c.bf16 %v1497_v56, %v1497_v56  ;;  %v1458_v5 = vpop.f32.mrb[10].mxu0  ;;  %v1499_v23 = vpop.f32.mrb[10].mxu1 }
 0x849   :  { %v1459_v31 = vpop.f32.mrb[11].mxu0  ;;  %v1500_v4 = vpop.f32.mrb[11].mxu1 }
 0x84a   :  { %1730 = vmatprep.mubr.bf16.mxu0 %v1503_v20  ;;  %1770 = vmatprep.mubr.bf16.mxu1 %v1505_v30 }
 0x84b   :  { %1731 = vmatmul.mubr.bf16.vlgmr.msra.gmra.mrb[12].mxu0 %v1502_v26  ;;  %1771 = vmatmul.mubr.bf16.vlgmr.msra.gmra.mrb[12].mxu1 %v1504_v52 }
 0x84c   :  { %1845 = vmatpush1.bf16.msra.mxu0 %v3486_v13  ;;  %1886 = vmatpush1.bf16.msra.mxu1 %v3487_v58 }
 0x84d   :  { %1876 = vmatprep.mubr.bf16.mxu0 %v3478_v0  ;;  %1917 = vmatprep.mubr.bf16.mxu1 %v3478_v0 }
 0x84e   :  { %2147 = vmatprep.subr.bf16.mxu0 %v3209_v22  ;;  %2169 = vmatprep.subr.bf16.mxu1 %v3214_v61 }
 0x853   :  { %2101 = vmatmul.mubr.msk.bf16.vlgmr.msra.gmra.mrb[16].mxu0 %vm1840_vm12, %v1839_v51  ;;  %2102 = vmatmul.mubr.msk.bf16.vlgmr.msra.gmra.mrb[16].mxu1 %vm1840_vm12, %v1839_v51 }
 0x854   :  { %2148 = vmatpush3.bf16.msra.mxu0 %v3225_v28  ;;  %2170 = vmatpush3.bf16.msra.mxu1 %v3230_v45 }
 0x855   :  { %2149 = vmatprep.subr.bf16.mxu0 %v3237_v55  ;;  %2171 = vmatprep.subr.bf16.mxu1 %v3242_v33 }
 0x858   :  { %2150 = vmatpush3.bf16.msra.mxu0 %v3251_v49  ;;  %2172 = vmatpush3.bf16.msra.mxu1 %v3256_v19 }
 0x859   :  { %2151 = vmatprep.subr.bf16.mxu0 %v3263_v16  ;;  %2173 = vmatprep.subr.bf16.mxu1 %v3268_v29 }
 0x85c   :  { %2152 = vmatpush3.bf16.msra.mxu0 %v3275_v62  ;;  %2174 = vmatpush3.bf16.msra.mxu1 %v3280_v14 }
 0x85d   :  { %2153 = vmatprep.subr.bf16.mxu0 %v3287_v57  ;;  %2175 = vmatprep.subr.bf16.mxu1 %v3292_v59 }
 0x860   :  { %2154 = vmatpush3.bf16.msra.mxu0 %v3299_v17  ;;  %2176 = vmatpush3.bf16.msra.mxu1 %v3304_v63 }
 0x861   :  { %2155 = vmatprep.subr.bf16.mxu0 %v3311_v50  ;;  %2177 = vmatprep.subr.bf16.mxu1 %v3316_v46 }
 0x864   :  { %2156 = vmatpush3.bf16.msra.mxu0 %v3323_v6  ;;  %2178 = vmatpush3.bf16.msra.mxu1 %v3328_v32 }
 0x865   :  { %2157 = vmatprep.subr.bf16.mxu0 %v3335_v39  ;;  %2179 = vmatprep.subr.bf16.mxu1 %v3340_v37 }
 0x868   :  { %2158 = vmatpush3.bf16.msra.mxu0 %v3347_v41  ;;  %2180 = vmatpush3.bf16.msra.mxu1 %v3352_v54 }
 0x869   :  { %2159 = vmatprep.subr.bf16.mxu0 %v3359_v7  ;;  %2181 = vmatprep.subr.bf16.mxu1 %v3364_v2 }
 0x86c   :  { %2160 = vmatpush3.bf16.msra.mxu0 %v3371_v3  ;;  %2182 = vmatpush3.bf16.msra.mxu1 %v3376_v48 }
 0x86d   :  { %2161 = vmatprep.subr.bf16.mxu0 %v3383_v25  ;;  %2183 = vmatprep.subr.bf16.mxu1 %v3388_v53 }
 0x870   :  { %2162 = vmatpush3.bf16.msra.mxu0 %v2244_v35  ;;  %2184 = vmatpush3.bf16.msra.mxu1 %v2245_v34 }
 0x91e   :  { %v2119_v0 = vpop.f32.mrb[12].mxu0  ;;  %v2141_v42 = vpop.f32.mrb[12].mxu1 }
 0x91f   :  { %v2120_v24 = vpop.f32.mrb[13].mxu0  ;;  %v2142_v38 = vpop.f32.mrb[13].mxu1 }
 0x920   :  { %v2121_v10 = vadd.f32 %v2120_v24, %v2119_v0  ;;  %v2143_v43 = vadd.f32 %v2142_v38, %v2141_v42  ;;  %v2122_v12 = vpop.f32.mrb[14].mxu0  ;;  %v2144_v44 = vpop.f32.mrb[14].mxu1 }
 0x921   :  { %v2123_v18 = vpop.f32.mrb[15].mxu0  ;;  %v2145_v15 = vpop.f32.mrb[15].mxu1 }
 0x922   :  { %v1773_v22 = vadd.f32 %v2143_v43, %v2121_v10 }
 0x924   :  { %1778 = vadd.xlane.f32.xlu1 %v1773_v22 }
 0x926   :  { %v1878_v61 = vpop.f32.mrb[16].mxu0  ;;  %v1919_v9 = vpop.f32.mrb[16].mxu1 }
 0x927   :  { %v1880_v27 = vpop.f32.mrb[17].mxu0  ;;  %v1921_v40 = vpop.f32.mrb[17].mxu1  ;;  %v1926_v49 = vpack.c.bf16 %v1878_v61, %v1878_v61  ;;  %v1928_v19 = vpack.c.bf16 %v1919_v9, %v1919_v9 }
 0x928   :  { %v1927_v28 = vpack.c.bf16 %v1880_v27, %v1880_v27  ;;  %v1929_v45 = vpack.c.bf16 %v1921_v40, %v1921_v40  ;;  %v1882_v55 = vpop.f32.mrb[18].mxu0  ;;  %v1923_v33 = vpop.f32.mrb[18].mxu1 }
 0x929   :  { %v1883_v16 = vpop.f32.mrb[19].mxu0  ;;  %v1924_v29 = vpop.f32.mrb[19].mxu1 }
 0x92a   :  { %1962 = vmatprep.mubr.bf16.mxu0 %v1927_v28  ;;  %2002 = vmatprep.mubr.bf16.mxu1 %v1929_v45 }
 0x92b   :  { %1963 = vmatmul.mubr.bf16.vlgmr.msra.gmra.mrb[20].mxu0 %v1926_v49  ;;  %2003 = vmatmul.mubr.bf16.vlgmr.msra.gmra.mrb[20].mxu1 %v1928_v19 }
 0x9b1   :  { %v1779_v62 = vpop.xlane.xlu1 %1778 }
 0x9b2   :  { %v1780_v14 = vmul.f32 0.0078125, %v1779_v62 }
 0x9b4   :  { %v1781_v41 = vsub.f32 %v1773_v22, %v1780_v14 }
 0x9b6   :  { %v1782_v7 = vmul.f32 %v1781_v41, %v1781_v41 }
 0x9fe   :  { %v2163_v57 = vpop.f32.mrb[20].mxu0  ;;  %v2185_v59 = vpop.f32.mrb[20].mxu1 }
 0x9ff   :  { %v2164_v17 = vpop.f32.mrb[21].mxu0  ;;  %v2186_v63 = vpop.f32.mrb[21].mxu1 }
 0xa00   :  { %v2165_v50 = vadd.f32 %v2164_v17, %v2163_v57  ;;  %v2187_v46 = vadd.f32 %v2186_v63, %v2185_v59  ;;  %v2166_v6 = vpop.f32.mrb[22].mxu0  ;;  %v2188_v32 = vpop.f32.mrb[22].mxu1 }
 0xa01   :  { %v2167_v39 = vpop.f32.mrb[23].mxu0  ;;  %v2189_v37 = vpop.f32.mrb[23].mxu1 }
 0xa02   :  { %v2005_v54 = vadd.f32 %v2187_v46, %v2165_v50 }
 0xa04   :  { %2010 = vadd.xlane.f32.xlu0 %v2005_v54 }
 0xa08   :  { %1783 = vadd.xlane.f32.xlu0 %v1782_v7 }
 0xa91   :  { %v2011_v2 = vpop.xlane.xlu0 %2010 }
 0xa92   :  { %v2012_v3 = vmul.f32 0.0078125, %v2011_v2 }
 0xa94   :  { %v2013_v48 = vsub.f32 %v2005_v54, %v2012_v3 }
 0xa95   :  { %v1784_v25 = vpop.xlane.xlu0 %1783 }
 0xa96   :  { %v1785_v53 = vmul.f32 0.0078125, %v1784_v25  ;;  %v2014_v35 = vmul.f32 %v2013_v48, %v2013_v48 }
 0xa98   :  { %v1786_v34 = vadd.f32 1e-05, %v1785_v53  ;;  %2015 = vadd.xlane.f32.xlu1 %v2014_v35 }
 0xa9a   :  { %2250 = vrsqrt.f32 %v1786_v34 }
 0xaa4   :  { %v2251_v47 = vpop.eup %2250 }
 0xaa5   :  { %v1788_v8 = vmul.f32 %v2251_v47, %v100_v36 }
 0xaa7   :  { %1791 = vperm.xlu0 %2207, %v1788_v8  }
 0xaa9   :  { %1797 = vperm.xlu1 %2208, %v100_v36  }
 0xaab   :  { %2211 = vset.pattern.permute.xlu0 %v2265_v21 }
 0xaad   :  { %2209 = vset.pattern.permute.xlu1 %v2264_v11 }
 0xb25   :  { %v2016_v60 = vpop.xlane.xlu1 %2015 }
 0xb26   :  { %v2017_v1 = vmul.f32 0.0078125, %v2016_v60  ;;  %v1792_v5 = vpop.permute.xlu0 %1791 }
 0xb27   :  { %v1794_v26 = vmul.f32 %v1792_v5, %v1781_v41 }
 0xb28   :  { %v2018_v56 = vadd.f32 1e-05, %v2017_v1 }
 0xb29   :  { %v1798_v23 = vpop.permute.xlu1 %1797 }
 0xb2a   :  { %2252 = vrsqrt.f32 %v2018_v56  ;;  %v1800_v31 = vadd.f32 %v1798_v23, %v1794_v26 }
 0xb2c   :  { %v1801_v58 = vmax.f32 %v1800_v31, 0.0 }
 0xb34   :  { %v2253_v20 = vpop.eup %2252 }
 0xb35   :  { %v2020_v30 = vmul.f32 %v2253_v20, %v100_v36 }
 0xb37   :  { %2023 = vperm.xlu1 %2209, %v2020_v30  }
 0xb3b   :  { %2210 = vset.pattern.permute.xlu1 %v2265_v21 }
 0xb3c   :  { %2028 = vperm.xlu1 %2210, %v100_v36  }
 0xbb6   :  { %v2024_v52 = vpop.permute.xlu1 %2023 }
 0xbb7   :  { %v2026_v4 = vmul.f32 %v2024_v52, %v2013_v48 }
 0xbbb   :  { %v2029_v13 = vpop.permute.xlu1 %2028 }
 0xbbc   :  { %v2031_v51 = vadd.f32 %v2029_v13, %v2026_v4 }
 0xbbe   :  { %v2032_v11 = vadd.f32 %v2031_v51, %v1801_v58 }
 0xbc0   :  { %v2033_v0 = vmax.f32 %v2032_v11, 0.0 }
 0xbc2   :  { %2034 = vst [vmem:[%s3458_s9] sm:$0xff] %v2033_v0 }

</bundles_post_ra>
